<compile_context>
chip_gen: v6e
topology: v6e:2x2x1
jax: 0.10.0
libtpu: 0.0.40
codegen_flags: <defaults>
</compile_context>

<pallas_src>
import jax
import jax.numpy as jnp
from jax.experimental import pallas as pl
from jax.experimental.pallas import tpu as pltpu


def _round_up(x, m):
    return ((x + m - 1) // m) * m


# ----------------------------------------------------------------------------
# Fused kernel: GAP -> Linear(C, 2048) -> [h] -> Linear(2048,512) -> ReLU
#               -> Linear(512,128) -> [z]
# ----------------------------------------------------------------------------
def _moco_fused_kernel(x_ref, w_enc_ref, b_enc_ref, w1_ref, b1_ref,
                       w2_ref, b2_ref, h_ref, z_ref):
    # x_ref: (TB, C, HWp) bf16   weights: bf16   biases: f32
    # Global average pool: spatial sum in f32 (zero-padded lanes contribute
    # nothing); the 1/(H*W) scale is folded into w_enc by the wrapper.
    pooled = jnp.sum(x_ref[...].astype(jnp.float32), axis=-1)          # (TB, C)

    # Encoder linear: bf16 operands, f32 MXU accumulation.
    h = jnp.dot(pooled.astype(jnp.bfloat16), w_enc_ref[...],
                preferred_element_type=jnp.float32) + b_enc_ref[...]   # (TB, 2048)
    h_ref[...] = h.astype(h_ref.dtype)

    # Projection head (fused, h never leaves VMEM on its way to z).
    a = jnp.dot(h.astype(jnp.bfloat16), w1_ref[...],
                preferred_element_type=jnp.float32) + b1_ref[...]      # (TB, 512)
    a = jnp.maximum(a, 0.0)                                            # ReLU in f32 (VPU)
    z = jnp.dot(a.astype(jnp.bfloat16), w2_ref[...],
                preferred_element_type=jnp.float32) + b2_ref[...]      # (TB, 128)
    z_ref[...] = z.astype(z_ref.dtype)


# ----------------------------------------------------------------------------
# Wrapper
# ----------------------------------------------------------------------------
def moco_forward(x, params, *, batch_block=128):
    """Full MoCoModel.forward: returns (h, z) with h:(N,2048) f32, z:(N,128) f32."""
    assert batch_block % 8 == 0 and batch_block >= 8
    n, c, hh, ww = x.shape
    hw = hh * ww
    hw_pad = _round_up(hw, 128)              # lane-dense spatial dim
    feat = params["w_enc"].shape[1]          # 2048
    hidden = params["w1"].shape[1]           # 512
    proj = params["w2"].shape[1]             # 128

    # bf16 matmul operands; fold the GAP's 1/(H*W) into the encoder weight.
    x_flat = x.reshape(n, c, hw).astype(jnp.bfloat16)
    if hw_pad != hw:
        x_flat = jnp.pad(x_flat, ((0, 0), (0, 0), (0, hw_pad - hw)))
    w_enc = (params["w_enc"] * (1.0 / hw)).astype(jnp.bfloat16)
    w1 = params["w1"].astype(jnp.bfloat16)
    w2 = params["w2"].astype(jnp.bfloat16)
    b_enc = params["b_enc"].astype(jnp.float32)
    b1 = params["b1"].astype(jnp.float32)
    b2 = params["b2"].astype(jnp.float32)

    # Batch tile: MXU-aligned (128) for large batches, 8-row minimum (f32
    # sublane) for small ones. Tiles stay well inside v7x's 64 MiB VMEM:
    # resident bf16 weights (~a few MiB) + 2x double-buffered x/h/z tiles.
    tb = min(batch_block, max(8, _round_up(n, 8)))
    n_pad = _round_up(n, tb)
    if n_pad != n:
        x_flat = jnp.pad(x_flat, ((0, n_pad - n), (0, 0), (0, 0)))

    grid = (n_pad // tb,)

    h_pad, z_pad = pl.pallas_call(
        _moco_fused_kernel,
        out_shape=(
            jax.ShapeDtypeStruct((n_pad, feat), jnp.float32),
            jax.ShapeDtypeStruct((n_pad, proj), jnp.float32),
        ),
        grid=grid,
        in_specs=[
            # Batch-tiled activation: double-buffered across grid steps.
            pl.BlockSpec((tb, c, hw_pad), lambda i: (i, 0, 0)),
            # Weights/biases: same block every step -> DMA'd once, resident.
            pl.BlockSpec((c, feat), lambda i: (0, 0)),
            pl.BlockSpec((1, feat), lambda i: (0, 0)),
            pl.BlockSpec((feat, hidden), lambda i: (0, 0)),
            pl.BlockSpec((1, hidden), lambda i: (0, 0)),
            pl.BlockSpec((hidden, proj), lambda i: (0, 0)),
            pl.BlockSpec((1, proj), lambda i: (0, 0)),
        ],
        out_specs=(
            pl.BlockSpec((tb, feat), lambda i: (i, 0)),
            pl.BlockSpec((tb, proj), lambda i: (i, 0)),
        ),
        compiler_params=pltpu.CompilerParams(
            dimension_semantics=("parallel",),   # shard batch tiles across TCs (v7x)
        ),
    )(x_flat, w_enc, b_enc, w1, b1, w2, b2)

    return h_pad[:n], z_pad[:n]


# ----------------------------------------------------------------------------
# Deterministic parameter init (PyTorch nn.Linear weight is (out, in); we
# store transposed (in, out) f32 copies so kernels do plain row @ weight).
# ----------------------------------------------------------------------------
def init_params(key, in_channels, feat_dim=2048, hidden=512, proj_dim=128):
    k_enc, k1, k2 = jax.random.split(key, 3)
    scale_enc = 1.0 / jnp.sqrt(in_channels)
    scale1 = 1.0 / jnp.sqrt(feat_dim)
    scale2 = 1.0 / jnp.sqrt(hidden)
    return {
        "w_enc": (jax.random.normal(k_enc, (in_channels, feat_dim),
                                    jnp.float32) * scale_enc),
        "b_enc": jnp.zeros((1, feat_dim), jnp.float32),
        "w1": jax.random.normal(k1, (feat_dim, hidden), jnp.float32) * scale1,
        "b1": jnp.full((1, hidden), 0.01, jnp.float32),
        "w2": jax.random.normal(k2, (hidden, proj_dim), jnp.float32) * scale2,
        "b2": jnp.full((1, proj_dim), 0.01, jnp.float32),
    }


# ----------------------------------------------------------------------------
# Pure-JAX reference that mirrors the kernel's bf16-operand / f32-accum math.
# ----------------------------------------------------------------------------
def reference_forward(x, params):
    n, c, hh, ww = x.shape
    hw = hh * ww
    xb = x.reshape(n, c, hw).astype(jnp.bfloat16)
    pooled = jnp.sum(xb.astype(jnp.float32), axis=-1)
    w_enc = (params["w_enc"] * (1.0 / hw)).astype(jnp.bfloat16)
    h = jnp.dot(pooled.astype(jnp.bfloat16), w_enc,
                preferred_element_type=jnp.float32) + params["b_enc"]
    a = jnp.maximum(
        jnp.dot(h.astype(jnp.bfloat16), params["w1"].astype(jnp.bfloat16),
                preferred_element_type=jnp.float32) + params["b1"], 0.0)
    z = jnp.dot(a.astype(jnp.bfloat16), params["w2"].astype(jnp.bfloat16),
                preferred_element_type=jnp.float32) + params["b2"]
    return h, z


# ----------------------------------------------------------------------------
if __name__ == "__main__":
    key = jax.random.PRNGKey(0)
    kx, kp = jax.random.split(key)

    # Small shapes consistent with the module: NCHW input, 2048-d features,
    # 128-d projections.
    N, C, H, W = 2, 4, 16, 16
    x = jax.random.normal(kx, (N, C, H, W), jnp.float32)
    params = init_params(kp, in_channels=C)

    h, z = jax.jit(moco_forward)(x, params)
    jax.block_until_ready((h, z))

    assert h.shape == (N, 2048) and z.shape == (N, 128)
    assert h.dtype == jnp.float32 and z.dtype == jnp.float32

    # Tight check against a bf16/f32-accum matched reference.
    h_ref, z_ref = reference_forward(x, params)
    assert jnp.allclose(h, h_ref, atol=1e-3, rtol=1e-3)
    assert jnp.allclose(z, z_ref, atol=1e-3, rtol=1e-3)

    # Loose sanity check against the pure-f32 module semantics.
    pooled32 = jnp.mean(x.reshape(N, C, H * W), axis=-1)
    h32 = pooled32 @ params["w_enc"] + params["b_enc"]
    a32 = jnp.maximum(h32 @ params["w1"] + params["b1"], 0.0)
    z32 = a32 @ params["w2"] + params["b2"]
    assert jnp.allclose(h, h32, atol=2e-2, rtol=2e-2)
    assert jnp.allclose(z, z32, atol=2e-2, rtol=2e-2)

    print("KERNEL_OK")
</pallas_src>

<mosaic_0001>
module attributes {stable_mosaic.version = 11 : i64} {
  func.func @_moco_fused_kernel(%arg0: i32, %arg1: memref<8x4x256xbf16, #tpu.memory_space<vmem>>, %arg2: memref<4x2048xbf16, #tpu.memory_space<vmem>>, %arg3: memref<1x2048xf32, #tpu.memory_space<vmem>>, %arg4: memref<2048x512xbf16, #tpu.memory_space<vmem>>, %arg5: memref<1x512xf32, #tpu.memory_space<vmem>>, %arg6: memref<512x128xbf16, #tpu.memory_space<vmem>>, %arg7: memref<1x128xf32, #tpu.memory_space<vmem>>, %arg8: memref<8x2048xf32, #tpu.memory_space<vmem>>, %arg9: memref<8x128xf32, #tpu.memory_space<vmem>>) attributes {dimension_semantics = [#tpu.dimension_semantics<parallel>], iteration_bounds = array<i64: 1>, scalar_prefetch = 0 : i64, scratch_operands = 0 : i64, tpu.core_type = #tpu.core_type<tc>, window_params = [{transform_indices = @transform_0, window_bounds = array<i64: 8, 4, 256>}, {pipeline_mode = #tpu.pipeline_mode<synchronous>, transform_indices = @transform_1, window_bounds = array<i64: 4, 2048>}, {pipeline_mode = #tpu.pipeline_mode<synchronous>, transform_indices = @transform_2, window_bounds = array<i64: 1, 2048>}, {pipeline_mode = #tpu.pipeline_mode<synchronous>, transform_indices = @transform_3, window_bounds = array<i64: 2048, 512>}, {pipeline_mode = #tpu.pipeline_mode<synchronous>, transform_indices = @transform_4, window_bounds = array<i64: 1, 512>}, {pipeline_mode = #tpu.pipeline_mode<synchronous>, transform_indices = @transform_5, window_bounds = array<i64: 512, 128>}, {pipeline_mode = #tpu.pipeline_mode<synchronous>, transform_indices = @transform_6, window_bounds = array<i64: 1, 128>}, {transform_indices = @transform_7, window_bounds = array<i64: 8, 2048>}, {transform_indices = @transform_8, window_bounds = array<i64: 8, 128>}]} {
    %c0 = arith.constant 0 : index
    %c0_0 = arith.constant 0 : index
    %c0_1 = arith.constant 0 : index
    %0 = vector.load %arg1[%c0, %c0_0, %c0_1] : memref<8x4x256xbf16, #tpu.memory_space<vmem>>, vector<8x4x256xbf16>
    %1 = arith.extf %0 : vector<8x4x256xbf16> to vector<8x4x256xf32>
    %cst = arith.constant dense<0.000000e+00> : vector<8x4xf32>
    %2 = vector.multi_reduction <add>, %1, %cst [2] : vector<8x4x256xf32> to vector<8x4xf32>
    %3 = arith.truncf %2 : vector<8x4xf32> to vector<8x4xbf16>
    %c0_2 = arith.constant 0 : index
    %c0_3 = arith.constant 0 : index
    %4 = vector.load %arg2[%c0_2, %c0_3] : memref<4x2048xbf16, #tpu.memory_space<vmem>>, vector<4x2048xbf16>
    %cst_4 = arith.constant dense<0.000000e+00> : vector<8x2048xf32>
    %5 = tpu.matmul %3, %4, %cst_4 {dimension_numbers = #tpu.dot_dimension_numbers<[1], [0], [0], [1], [0, 0, 1, 1], [], []>} : vector<8x4xbf16>, vector<4x2048xbf16>, vector<8x2048xf32> -> vector<8x2048xf32>
    %c0_5 = arith.constant 0 : index
    %c0_6 = arith.constant 0 : index
    %6 = vector.load %arg3[%c0_5, %c0_6] : memref<1x2048xf32, #tpu.memory_space<vmem>>, vector<1x2048xf32>
    %7 = vector.broadcast %6 : vector<1x2048xf32> to vector<8x2048xf32>
    %8 = arith.addf %5, %7 : vector<8x2048xf32>
    %c0_7 = arith.constant 0 : index
    %c0_8 = arith.constant 0 : index
    %9 = vector.load %arg8[%c0_7, %c0_8] : memref<8x2048xf32, #tpu.memory_space<vmem>>, vector<8x2048xf32>
    tpu.vector_store %arg8[%c0_7, %c0_8], %8 {strides = array<i32>} : memref<8x2048xf32, #tpu.memory_space<vmem>>, vector<8x2048xf32>,
    %10 = arith.truncf %8 : vector<8x2048xf32> to vector<8x2048xbf16>
    %c0_9 = arith.constant 0 : index
    %c0_10 = arith.constant 0 : index
    %11 = vector.load %arg4[%c0_9, %c0_10] : memref<2048x512xbf16, #tpu.memory_space<vmem>>, vector<2048x512xbf16>
    %cst_11 = arith.constant dense<0.000000e+00> : vector<8x512xf32>
    %12 = tpu.matmul %10, %11, %cst_11 {dimension_numbers = #tpu.dot_dimension_numbers<[1], [0], [0], [1], [0, 0, 1, 1], [], []>} : vector<8x2048xbf16>, vector<2048x512xbf16>, vector<8x512xf32> -> vector<8x512xf32>
    %c0_12 = arith.constant 0 : index
    %c0_13 = arith.constant 0 : index
    %13 = vector.load %arg5[%c0_12, %c0_13] : memref<1x512xf32, #tpu.memory_space<vmem>>, vector<1x512xf32>
    %14 = vector.broadcast %13 : vector<1x512xf32> to vector<8x512xf32>
    %15 = arith.addf %12, %14 : vector<8x512xf32>
    %cst_14 = arith.constant 0.000000e+00 : f32
    %16 = vector.broadcast %cst_14 : f32 to vector<8x512xf32>
    %17 = arith.maximumf %15, %16 : vector<8x512xf32>
    %18 = arith.truncf %17 : vector<8x512xf32> to vector<8x512xbf16>
    %c0_15 = arith.constant 0 : index
    %c0_16 = arith.constant 0 : index
    %19 = vector.load %arg6[%c0_15, %c0_16] : memref<512x128xbf16, #tpu.memory_space<vmem>>, vector<512x128xbf16>
    %cst_17 = arith.constant dense<0.000000e+00> : vector<8x128xf32>
    %20 = tpu.matmul %18, %19, %cst_17 {dimension_numbers = #tpu.dot_dimension_numbers<[1], [0], [0], [1], [0, 0, 1, 1], [], []>} : vector<8x512xbf16>, vector<512x128xbf16>, vector<8x128xf32> -> vector<8x128xf32>
    %c0_18 = arith.constant 0 : index
    %c0_19 = arith.constant 0 : index
    %21 = vector.load %arg7[%c0_18, %c0_19] : memref<1x128xf32, #tpu.memory_space<vmem>>, vector<1x128xf32>
    %22 = vector.broadcast %21 : vector<1x128xf32> to vector<8x128xf32>
    %23 = arith.addf %20, %22 : vector<8x128xf32>
    %c0_20 = arith.constant 0 : index
    %c0_21 = arith.constant 0 : index
    %24 = vector.load %arg9[%c0_20, %c0_21] : memref<8x128xf32, #tpu.memory_space<vmem>>, vector<8x128xf32>
    tpu.vector_store %arg9[%c0_20, %c0_21], %23 {strides = array<i32>} : memref<8x128xf32, #tpu.memory_space<vmem>>, vector<8x128xf32>,
    return
  }
  func.func @transform_0(%arg0: i32) -> (i32, i32, i32) {
    %c0_i32 = arith.constant 0 : i32
    %c0_i32_0 = arith.constant 0 : i32
    %c0_i32_1 = arith.constant 0 : i32
    return %arg0, %c0_i32, %c0_i32_0 : i32, i32, i32
  }
  func.func @transform_1(%arg0: i32) -> (i32, i32) {
    %c0_i32 = arith.constant 0 : i32
    %c0_i32_0 = arith.constant 0 : i32
    %c0_i32_1 = arith.constant 0 : i32
    return %c0_i32, %c0_i32_0 : i32, i32
  }
  func.func @transform_2(%arg0: i32) -> (i32, i32) {
    %c0_i32 = arith.constant 0 : i32
    %c0_i32_0 = arith.constant 0 : i32
    %c0_i32_1 = arith.constant 0 : i32
    return %c0_i32, %c0_i32_0 : i32, i32
  }
  func.func @transform_3(%arg0: i32) -> (i32, i32) {
    %c0_i32 = arith.constant 0 : i32
    %c0_i32_0 = arith.constant 0 : i32
    %c0_i32_1 = arith.constant 0 : i32
    return %c0_i32, %c0_i32_0 : i32, i32
  }
  func.func @transform_4(%arg0: i32) -> (i32, i32) {
    %c0_i32 = arith.constant 0 : i32
    %c0_i32_0 = arith.constant 0 : i32
    %c0_i32_1 = arith.constant 0 : i32
    return %c0_i32, %c0_i32_0 : i32, i32
  }
  func.func @transform_5(%arg0: i32) -> (i32, i32) {
    %c0_i32 = arith.constant 0 : i32
    %c0_i32_0 = arith.constant 0 : i32
    %c0_i32_1 = arith.constant 0 : i32
    return %c0_i32, %c0_i32_0 : i32, i32
  }
  func.func @transform_6(%arg0: i32) -> (i32, i32) {
    %c0_i32 = arith.constant 0 : i32
    %c0_i32_0 = arith.constant 0 : i32
    %c0_i32_1 = arith.constant 0 : i32
    return %c0_i32, %c0_i32_0 : i32, i32
  }
  func.func @transform_7(%arg0: i32) -> (i32, i32) {
    %c0_i32 = arith.constant 0 : i32
    %c0_i32_0 = arith.constant 0 : i32
    return %arg0, %c0_i32 : i32, i32
  }
  func.func @transform_8(%arg0: i32) -> (i32, i32) {
    %c0_i32 = arith.constant 0 : i32
    %c0_i32_0 = arith.constant 0 : i32
    return %arg0, %c0_i32 : i32, i32
  }
}

</mosaic_0001>

<bundles_post_ra>
// kernel: moco_forward.1
= control target key start
LH: loop header
LB: loop body
LE: loop exit
PB: predicated region body
PF: predicated region fallthrough
CT: control target
= control target key end

     0   :  { %vm69_vm0 = vcmask 1043456   ;;  %v126_v44 = vlaneseq  ;;  %v6297_v45 = vmov 1983009808   ;;  %vm347_vm1 = vcmask 1041408   ;;  %s8343_s0 = inlined_call_operand.vmem [shape: bf16[8,4,256], index: 0, kind: input, shape index: {}]   ;;  %s8344_s1 = inlined_call_operand.vmem [shape: bf16[4,2048], index: 1, kind: input, shape index: {}]   ;;  %s8345_s3 = inlined_call_operand.vmem [shape: bf16[2048,512], index: 3, kind: input, shape index: {}]   ;;  %s8346_s2 = inlined_call_operand.vmem [shape: f32[1,2048], index: 2, kind: input, shape index: {}]   ;;  %s8347_s7 = inlined_call_operand.vmem [shape: f32[8,2048], index: 7, kind: output, shape index: {0}]   ;;  %s8348_s4 = inlined_call_operand.vmem [shape: f32[1,512], index: 4, kind: input, shape index: {}]   ;;  %s8349_s5 = inlined_call_operand.vmem [shape: bf16[512,128], index: 5, kind: input, shape index: {}]   ;;  %s8350_s6 = inlined_call_operand.vmem [shape: f32[1,128], index: 6, kind: input, shape index: {}]   ;;  %s8351_s8 = inlined_call_operand.vmem [shape: f32[8,128], index: 8, kind: output, shape index: {1}]  }
   0x1   :  { %v5428_v0 = vld [vmem:[%s8343_s0] sm:$0xff]   ;;  %v5443_v1 = vld [vmem:[%s8343_s0 + $0x8] sm:$0xff]   ;;  %v5444_v2 = vld [vmem:[%s8343_s0 + $0x10] sm:$0xff]   ;;  %v277_v46 = vunpack.c.l.s4 %v6297_v45  ;;  %v6298_v60 = vmov 0   ;;  %vm256_vm2 = vcmask 1041409   ;;  %vm258_vm3 = vcmask 1042434  }
   0x2   :  { %v5429_v3 = vunpack.c.l.bf16 %v5428_v0  ;;  %v5433_v4 = vunpack.c.l.bf16 %v5443_v1  ;;  %v5430_v5 = vunpack.c.h.bf16 %v5428_v0  ;;  %v5434_v6 = vunpack.c.h.bf16 %v5443_v1  ;;  %v5445_v7 = vld [vmem:[%s8343_s0 + $0x18] sm:$0xff]   ;;  %v118_v49 = vld [vmem:[%s8344_s1] sm:$0xff]  ;;  %v119_v58 = vld [vmem:[%s8344_s1 + $0x8] sm:$0xff]  ;;  %428 = vmatprep.mubr.bf16.mxu0 %v6298_v60  ;;  %469 = vmatprep.mubr.bf16.mxu1 %v6298_v60 }
   0x3   :  { %v5437_v8 = vunpack.c.l.bf16 %v5444_v2  ;;  %v5438_v9 = vunpack.c.h.bf16 %v5444_v2  ;;  %v5441_v10 = vunpack.c.l.bf16 %v5445_v7  ;;  %v5442_v18 = vunpack.c.h.bf16 %v5445_v7  ;;  %v120_v1 = vld [vmem:[%s8344_s1 + $0x10] sm:$0xff] }
   0x4   :  { %v53_v11 = vcombine.high %v5429_v3, %v5429_v3  ;;  %v70_v12 = vsel %vm69_vm0, %v5429_v3, 0.0  ;;  %v55_v13 = vcombine.high %v5433_v4, %v5433_v4  ;;  %v80_v14 = vsel %vm69_vm0, %v5433_v4, 0.0 }
   0x5   :  { %v54_v15 = vcombine.high %v5430_v5, %v5430_v5  ;;  %v75_v16 = vsel %vm69_vm0, %v5430_v5, 0.0  ;;  %v56_v17 = vcombine.high %v5434_v6, %v5434_v6  ;;  %v85_v21 = vsel %vm69_vm0, %v5434_v6, 0.0  ;;  %v121_v5 = vld [vmem:[%s8344_s1 + $0x18] sm:$0xff] }
   0x6   :  { %v71_v19 = vsel %vm69_vm0, %v53_v11, 0.0  ;;  %v81_v20 = vsel %vm69_vm0, %v55_v13, 0.0  ;;  %v57_v22 = vcombine.high %v5437_v8, %v5437_v8  ;;  %v58_v27 = vcombine.high %v5438_v9, %v5438_v9 }
   0x7   :  { %v72_v23 = vadd.f32 %v71_v19, %v70_v12  ;;  %v82_v24 = vadd.f32 %v81_v20, %v80_v14  ;;  %v76_v25 = vsel %vm69_vm0, %v54_v15, 0.0  ;;  %v86_v26 = vsel %vm69_vm0, %v56_v17, 0.0 }
   0x8   :  { %v77_v28 = vadd.f32 %v76_v25, %v75_v16  ;;  %v87_v29 = vadd.f32 %v86_v26, %v85_v21  ;;  %v90_v30 = vsel %vm69_vm0, %v5437_v8, 0.0  ;;  %v91_v31 = vsel %vm69_vm0, %v57_v22, 0.0 }
   0x9   :  { %73 = vadd.xlane.f32.xlu0 %v72_v23  ;;  %83 = vadd.xlane.f32.xlu1 %v82_v24  ;;  %v95_v32 = vsel %vm69_vm0, %v5438_v9, 0.0  ;;  %v96_v33 = vsel %vm69_vm0, %v58_v27, 0.0  ;;  %v59_v34 = vcombine.high %v5441_v10, %v5441_v10  ;;  %v60_v35 = vcombine.high %v5442_v18, %v5442_v18 }
   0xa   :  { %v92_v36 = vadd.f32 %v91_v31, %v90_v30  ;;  %v97_v37 = vadd.f32 %v96_v33, %v95_v32  ;;  %v100_v38 = vsel %vm69_vm0, %v5441_v10, 0.0  ;;  %v105_v40 = vsel %vm69_vm0, %v5442_v18, 0.0 }
   0xb   :  { %v101_v39 = vsel %vm69_vm0, %v59_v34, 0.0  ;;  %v106_v41 = vsel %vm69_vm0, %v60_v35, 0.0  ;;  %v6372_v47 = vshrl.u32 %v126_v44, 7  ;;  %v278_v48 = vunpack.c.0.s8 %v277_v46 }
   0xc   :  { %v102_v42 = vadd.f32 %v101_v39, %v100_v38  ;;  %v107_v43 = vadd.f32 %v106_v41, %v105_v40  ;;  %v275_v51 = vcombine.high %v118_v49, %v118_v49  ;;  %v292_v59 = vcombine.high %v119_v58, %v119_v58 }
   0xd   :  { %78 = vadd.xlane.f32.xlu0 %v77_v28  ;;  %88 = vadd.xlane.f32.xlu1 %v87_v29  ;;  %v281_v50 = vsub.s32 %v278_v48, %v6372_v47  ;;  %v309_v2 = vcombine.high %v120_v1, %v120_v1  ;;  %v326_v6 = vcombine.high %v121_v5, %v121_v5  ;;  %v223_v9 = vand.u32 127, %v126_v44 }
   0xe   :  { %vm260_vm4 = vcmask 1043459   ;;  %vm262_vm5 = vcmask 1044484   ;;  %vm264_vm6 = vcmask 1045509   ;;  %vm266_vm7 = vcmask 1046534  }
   0xf   :  { %v282_v52 = vrot.slane %v118_v49, %v281_v50  ;;  %v289_v53 = vrot.slane %v275_v51, %v281_v50  ;;  %v6387_v61 = vrot.slane %v119_v58, %v281_v50  ;;  %v6389_v62 = vrot.slane %v292_v59, %v281_v50 }
  0x10   :  { %v6400_v3 = vrot.slane %v120_v1, %v281_v50  ;;  %v6402_v4 = vrot.slane %v309_v2, %v281_v50  ;;  %v6407_v7 = vrot.slane %v121_v5, %v281_v50  ;;  %v6409_v8 = vrot.slane %v326_v6, %v281_v50  ;;  %v5496_v1 = vld [vmem:[%s8345_s3 + $0xe0] ss:$16 sps:$4 sm:$0xff]   ;;  %v5510_v6 = vld [vmem:[%s8345_s3 + $0xa4] ss:$16 sps:$4 sm:$0xff]  }
  0x11   :  { %93 = vadd.xlane.f32.xlu0 %v92_v36  ;;  %98 = vadd.xlane.f32.xlu1 %v97_v37  ;;  %v290_v54 = vcombine.high %v282_v52, %v282_v52  ;;  %v291_v55 = vcombine.high %v289_v53, %v289_v53  ;;  %v349_v56 = vsel %vm347_vm1, %v282_v52, 0  ;;  %v355_v57 = vsel %vm347_vm1, %v289_v53, 0  ;;  %v5499_v2 = vld [vmem:[%s8345_s3 + $0x2e0] ss:$16 sps:$4 sm:$0xff]  }
  0x12   :  { %v307_v63 = vcombine.high %v6387_v61, %v6387_v61  ;;  %v308_v0 = vcombine.high %v6389_v62, %v6389_v62  ;;  %v226_v14 = vsub.s32 %v223_v9, %v6372_v47  ;;  %vm268_vm8 = vcmask 1047559   ;;  %v5505_v5 = vld [vmem:[%s8345_s3 + $0x2c0] ss:$16 sps:$4 sm:$0xff]  }
  0x13   :  { %4866 = vmatprep.subr.msk.bf16.mxu0 %vm347_vm1, %v290_v54  ;;  %4868 = vmatprep.subr.msk.bf16.mxu1 %vm347_vm1, %v291_v55  ;;  %vm343_vm9 = vcmask 31744   ;;  %v361_v52 = vsel %vm347_vm1, %v6387_v61, 0  ;;  %v367_v53 = vsel %vm347_vm1, %v6389_v62, 0  ;;  %v324_v54 = vcombine.high %v6400_v3, %v6400_v3  ;;  %v5498_v61 = vld [vmem:[%s8345_s3 + $0xe4] ss:$16 sps:$4 sm:$0xff]  }
  0x14   :  { %411 = vmatpush1.bf16.msra.mxu0 %v349_v56  ;;  %452 = vmatpush1.bf16.msra.mxu1 %v355_v57  ;;  %v325_v55 = vcombine.high %v6402_v4, %v6402_v4  ;;  %v373_v56 = vsel %vm347_vm1, %v6400_v3, 0  ;;  %v379_v57 = vsel %vm347_vm1, %v6402_v4, 0  ;;  %v341_v58 = vcombine.high %v6407_v7, %v6407_v7  ;;  %v5501_v62 = vld [vmem:[%s8345_s3 + $0x2e4] ss:$16 sps:$4 sm:$0xff]   ;;  %v5511_v9 = vld [vmem:[%s8345_s3 + $0x2a0] ss:$16 sps:$4 sm:$0xff]  }
  0x15   :  { %103 = vadd.xlane.f32.xlu0 %v102_v42  ;;  %108 = vadd.xlane.f32.xlu1 %v107_v43  ;;  %v342_v59 = vcombine.high %v6409_v8, %v6409_v8  ;;  %v5504_v3 = vld [vmem:[%s8345_s3 + $0xc4] ss:$16 sps:$4 sm:$0xff]  }
  0x16   :  { %4870 = vmatprep.subr.msk.bf16.mxu0 %vm347_vm1, %v307_v63  ;;  %4872 = vmatprep.subr.msk.bf16.mxu1 %vm347_vm1, %v308_v0  ;;  %v385_v63 = vsel %vm347_vm1, %v6407_v7, 0  ;;  %v391_v0 = vsel %vm347_vm1, %v6409_v8, 0  ;;  %v5507_v4 = vld [vmem:[%s8345_s3 + $0x2c4] ss:$16 sps:$4 sm:$0xff]   ;;  %v5508_v8 = vld [vmem:[%s8345_s3 + $0xa0] ss:$16 sps:$4 sm:$0xff]  }
  0x17   :  { %v5513_v7 = vld [vmem:[%s8345_s3 + $0x2a4] ss:$16 sps:$4 sm:$0xff]  }
  0x92   :  { %v74_v10 = vpop.xlane.xlu0 %73  ;;  %v84_v11 = vpop.xlane.xlu1 %83 }
  0x93   :  { %v110_v12 = vpack.c.bf16 %v74_v10, %v74_v10  ;;  %v112_v13 = vpack.c.bf16 %v84_v11, %v84_v11  ;;  %v5516_v10 = vld [vmem:[%s8345_s3 + $0x84] ss:$16 sps:$4 sm:$0xff]  }
  0x94   :  { %v5519_v11 = vld [vmem:[%s8345_s3 + $0x284] ss:$16 sps:$4 sm:$0xff]  }
  0x95   :  { %v214_v15 = vunpack.c.l.b16 %v110_v12  ;;  %v216_v20 = vunpack.c.l.b16 %v112_v13  ;;  %v5514_v12 = vld [vmem:[%s8345_s3 + $0x80] ss:$16 sps:$4 sm:$0xff]  }
  0x96   :  { %v79_v16 = vpop.xlane.xlu0 %78  ;;  %v89_v17 = vpop.xlane.xlu1 %88  ;;  %v5517_v13 = vld [vmem:[%s8345_s3 + $0x280] ss:$16 sps:$4 sm:$0xff]  }
  0x97   :  { %v111_v18 = vpack.c.bf16 %v79_v16, %v79_v16  ;;  %v113_v19 = vpack.c.bf16 %v89_v17, %v89_v17  ;;  %v227_v23 = vrot.slane %v214_v15, %v226_v14  ;;  %v235_v30 = vrot.slane %v216_v20, %v226_v14  ;;  %v5525_v15 = vld [vmem:[%s8345_s3 + $0x264] ss:$16 sps:$4 sm:$0xff]   ;;  %v5520_v16 = vld [vmem:[%s8345_s3 + $0x60] ss:$16 sps:$4 sm:$0xff]  }
  0x98   :  { %v5523_v17 = vld [vmem:[%s8345_s3 + $0x260] ss:$16 sps:$4 sm:$0xff]  }
  0x99   :  { %v215_v21 = vunpack.c.l.b16 %v111_v18  ;;  %v217_v22 = vunpack.c.l.b16 %v113_v19  ;;  %v5528_v18 = vld [vmem:[%s8345_s3 + $0x44] ss:$16 sps:$4 sm:$0xff]   ;;  %v5526_v20 = vld [vmem:[%s8345_s3 + $0x40] ss:$16 sps:$4 sm:$0xff]  }
  0x9a   :  { %v94_v24 = vpop.xlane.xlu0 %93  ;;  %v99_v25 = vpop.xlane.xlu1 %98  ;;  %v5531_v19 = vld [vmem:[%s8345_s3 + $0x244] ss:$16 sps:$4 sm:$0xff]  }
  0x9b   :  { %v231_v26 = vrot.slane %v215_v21, %v226_v14  ;;  %v239_v27 = vrot.slane %v217_v22, %v226_v14  ;;  %v114_v28 = vpack.c.bf16 %v94_v24, %v94_v24  ;;  %v115_v29 = vpack.c.bf16 %v99_v25, %v99_v25  ;;  %v5529_v21 = vld [vmem:[%s8345_s3 + $0x240] ss:$16 sps:$4 sm:$0xff]   ;;  %v5534_v22 = vld [vmem:[%s8345_s3 + $0x24] ss:$16 sps:$4 sm:$0xff]  }
  0x9c   :  { %v5532_v24 = vld [vmem:[%s8345_s3 + $0x20] ss:$16 sps:$4 sm:$0xff]  }
  0x9d   :  { %v257_v31 = vsel %vm256_vm2, %v231_v26, %v227_v23  ;;  %v218_v32 = vunpack.c.l.b16 %v114_v28  ;;  %v219_v33 = vunpack.c.l.b16 %v115_v29  ;;  %v5537_v23 = vld [vmem:[%s8345_s3 + $0x224] ss:$16 sps:$4 sm:$0xff]   ;;  %v5535_v25 = vld [vmem:[%s8345_s3 + $0x220] ss:$16 sps:$4 sm:$0xff]  }
  0x9e   :  { %v259_v34 = vsel %vm258_vm3, %v235_v30, %v257_v31  ;;  %v104_v35 = vpop.xlane.xlu0 %103  ;;  %v109_v36 = vpop.xlane.xlu1 %108  ;;  %v5540_v26 = vld [vmem:[%s8345_s3 + $0x4] ss:$16 sps:$4 sm:$0xff]   ;;  %v5538_v28 = vld [vmem:[%s8345_s3] ss:$16 sps:$4 sm:$0xff]  }
  0x9f   :  { %v261_v37 = vsel %vm260_vm4, %v239_v27, %v259_v34  ;;  %v243_v38 = vrot.slane %v218_v32, %v226_v14  ;;  %v116_v39 = vpack.c.bf16 %v104_v35, %v104_v35  ;;  %v247_v40 = vrot.slane %v219_v33, %v226_v14  ;;  %v5543_v27 = vld [vmem:[%s8345_s3 + $0x204] ss:$16 sps:$4 sm:$0xff]   ;;  %v5541_v29 = vld [vmem:[%s8345_s3 + $0x200] ss:$16 sps:$4 sm:$0xff]  }
  0xa0   :  { %v117_v41 = vpack.c.bf16 %v109_v36, %v109_v36  ;;  %v5546_v30 = vld [vmem:[%s8345_s3 + $0x1e4] ss:$16 sps:$4 sm:$0xff]   ;;  %v5544_v32 = vld [vmem:[%s8345_s3 + $0x1e0] ss:$16 sps:$4 sm:$0xff]  }
  0xa1   :  { %v263_v42 = vsel %vm262_vm5, %v243_v38, %v261_v37  ;;  %v220_v43 = vunpack.c.l.b16 %v116_v39  ;;  %v5549_v31 = vld [vmem:[%s8345_s3 + $0x3e4] ss:$16 sps:$4 sm:$0xff]   ;;  %v5547_v33 = vld [vmem:[%s8345_s3 + $0x3e0] ss:$16 sps:$4 sm:$0xff]  }
  0xa2   :  { %v221_v44 = vunpack.c.l.b16 %v117_v41  ;;  %v265_v46 = vsel %vm264_vm6, %v247_v40, %v263_v42  ;;  %v5552_v34 = vld [vmem:[%s8345_s3 + $0x1c4] ss:$16 sps:$4 sm:$0xff]   ;;  %v5550_v36 = vld [vmem:[%s8345_s3 + $0x1c0] ss:$16 sps:$4 sm:$0xff]  }
  0xa3   :  { %v251_v45 = vrot.slane %v220_v43, %v226_v14  ;;  %v5555_v35 = vld [vmem:[%s8345_s3 + $0x3c4] ss:$16 sps:$4 sm:$0xff]   ;;  %v5553_v37 = vld [vmem:[%s8345_s3 + $0x3c0] ss:$16 sps:$4 sm:$0xff]  }
  0xa4   :  { %v255_v48 = vrot.slane %v221_v44, %v226_v14  ;;  %v5522_v14 = vld [vmem:[%s8345_s3 + $0x64] ss:$16 sps:$4 sm:$0xff]   ;;  %v5556_v40 = vld [vmem:[%s8345_s3 + $0x1a0] ss:$16 sps:$4 sm:$0xff]  }
  0xa5   :  { %v267_v49 = vsel %vm266_vm7, %v251_v45, %v265_v46  ;;  %v5558_v38 = vld [vmem:[%s8345_s3 + $0x1a4] ss:$16 sps:$4 sm:$0xff]   ;;  %v5559_v41 = vld [vmem:[%s8345_s3 + $0x3a0] ss:$16 sps:$4 sm:$0xff]  }
  0xa6   :  { %v269_v50 = vsel %vm268_vm8, %v255_v48, %v267_v49  ;;  %v5561_v39 = vld [vmem:[%s8345_s3 + $0x3a4] ss:$16 sps:$4 sm:$0xff]   ;;  %v5562_v44 = vld [vmem:[%s8345_s3 + $0x180] ss:$16 sps:$4 sm:$0xff]  }
  0xa7   :  { %v270_v51 = vpack.c.b16 %v269_v50, %v269_v50  ;;  %v5564_v42 = vld [vmem:[%s8345_s3 + $0x184] ss:$16 sps:$4 sm:$0xff]   ;;  %v5565_v45 = vld [vmem:[%s8345_s3 + $0x380] ss:$16 sps:$4 sm:$0xff]  }
  0xa8   :  { %v5567_v43 = vld [vmem:[%s8345_s3 + $0x384] ss:$16 sps:$4 sm:$0xff]   ;;  %v5568_v49 = vld [vmem:[%s8345_s3 + $0x160] ss:$16 sps:$4 sm:$0xff]  }
  0xa9   :  { %4867 = vmatmul.mubr.msk.bf16.vlgmr.msra.gmra.mxu0 %vm343_vm9, %v270_v51  ;;  %4869 = vmatmul.mubr.msk.bf16.vlgmr.msra.gmra.mxu1 %vm343_vm9, %v270_v51  ;;  %v5570_v46 = vld [vmem:[%s8345_s3 + $0x164] ss:$16 sps:$4 sm:$0xff]   ;;  %v5571_v50 = vld [vmem:[%s8345_s3 + $0x360] ss:$16 sps:$4 sm:$0xff]  }
  0xaa   :  { %493 = vmatpush1.bf16.msra.mxu0 %v361_v52  ;;  %534 = vmatpush1.bf16.msra.mxu1 %v367_v53  ;;  %v5573_v48 = vld [vmem:[%s8345_s3 + $0x364] ss:$16 sps:$4 sm:$0xff]   ;;  %v5574_v53 = vld [vmem:[%s8345_s3 + $0x140] ss:$16 sps:$4 sm:$0xff]  }
  0xab   :  { %510 = vmatprep.mubr.bf16.mxu0 %v6298_v60  ;;  %551 = vmatprep.mubr.bf16.mxu1 %v6298_v60  ;;  %v5579_v52 = vld [vmem:[%s8345_s3 + $0x344] ss:$16 sps:$4 sm:$0xff]  }
  0xac   :  { %4874 = vmatprep.subr.msk.bf16.mxu0 %vm347_vm1, %v324_v54  ;;  %4876 = vmatprep.subr.msk.bf16.mxu1 %vm347_vm1, %v325_v55  ;;  %v5577_v54 = vld [vmem:[%s8345_s3 + $0x340] ss:$16 sps:$4 sm:$0xff]   ;;  %v5582_v55 = vld [vmem:[%s8345_s3 + $0x124] ss:$16 sps:$4 sm:$0xff]  }
  0xb1   :  { %4871 = vmatmul.mubr.msk.bf16.vlgmr.msra.gmra.mxu0 %vm343_vm9, %v270_v51  ;;  %4873 = vmatmul.mubr.msk.bf16.vlgmr.msra.gmra.mxu1 %vm343_vm9, %v270_v51 }
  0xb2   :  { %575 = vmatpush1.bf16.msra.mxu0 %v373_v56  ;;  %616 = vmatpush1.bf16.msra.mxu1 %v379_v57  ;;  %v5585_v56 = vld [vmem:[%s8345_s3 + $0x324] ss:$16 sps:$4 sm:$0xff]   ;;  %v5580_v57 = vld [vmem:[%s8345_s3 + $0x120] ss:$16 sps:$4 sm:$0xff]  }
  0xb3   :  { %592 = vmatprep.mubr.bf16.mxu0 %v6298_v60  ;;  %633 = vmatprep.mubr.bf16.mxu1 %v6298_v60 }
  0xb4   :  { %4878 = vmatprep.subr.msk.bf16.mxu0 %vm347_vm1, %v341_v58  ;;  %4880 = vmatprep.subr.msk.bf16.mxu1 %vm347_vm1, %v342_v59  ;;  %v5583_v58 = vld [vmem:[%s8345_s3 + $0x320] ss:$16 sps:$4 sm:$0xff]   ;;  %v5588_v59 = vld [vmem:[%s8345_s3 + $0x104] ss:$16 sps:$4 sm:$0xff]  }
  0xb9   :  { %4875 = vmatmul.mubr.msk.bf16.vlgmr.msra.gmra.mxu0 %vm343_vm9, %v270_v51  ;;  %4877 = vmatmul.mubr.msk.bf16.vlgmr.msra.gmra.mxu1 %vm343_vm9, %v270_v51 }
  0xba   :  { %657 = vmatpush1.bf16.msra.mxu0 %v385_v63  ;;  %698 = vmatpush1.bf16.msra.mxu1 %v391_v0  ;;  %v5589_v63 = vld [vmem:[%s8345_s3 + $0x300] ss:$16 sps:$4 sm:$0xff]   ;;  %v5594_v0 = vld [vmem:[%s8345_s3 + $0x4e4] ss:$16 sps:$4 sm:$0xff]  }
  0xbb   :  { %674 = vmatprep.mubr.bf16.mxu0 %v6298_v60  ;;  %715 = vmatprep.mubr.bf16.mxu1 %v6298_v60  ;;  %v5502_v60 = vld [vmem:[%s8345_s3 + $0xc0] ss:$16 sps:$4 sm:$0xff]  }
  0xbc   :  { %3850 = vmatprep.subr.bf16.mxu0 %v5498_v61  ;;  %3891 = vmatprep.subr.bf16.mxu1 %v5501_v62  ;;  %v5591_v61 = vld [vmem:[%s8345_s3 + $0x304] ss:$16 sps:$4 sm:$0xff]   ;;  %v5586_v62 = vld [vmem:[%s8345_s3 + $0x100] ss:$16 sps:$4 sm:$0xff]  }
  0xc1   :  { %4879 = vmatmul.mubr.msk.bf16.vlgmr.msra.gmra.mxu0 %vm343_vm9, %v270_v51  ;;  %4881 = vmatmul.mubr.msk.bf16.vlgmr.msra.gmra.mxu1 %vm343_vm9, %v270_v51  ;;  %v5576_v51 = vld [vmem:[%s8345_s3 + $0x144] ss:$16 sps:$4 sm:$0xff]  }
  0xc2   :  { %3851 = vmatpush1.bf16.msra.mxu0 %v5496_v1  ;;  %3892 = vmatpush1.bf16.msra.mxu1 %v5499_v2  ;;  %v5597_v1 = vld [vmem:[%s8345_s3 + $0x6e4] ss:$16 sps:$4 sm:$0xff]   ;;  %v6649_v2 = vsub.s32 0, %v6372_v47 }
  0xc3   :  { %3852 = vmatprep.subr.bf16.mxu0 %v5504_v3  ;;  %3893 = vmatprep.subr.bf16.mxu1 %v5507_v4  ;;  %v6652_v3 = vsub.s32 2, %v6372_v47  ;;  %v122_v4 = vld [vmem:[%s8346_s2] sm:$0xff] }
  0xc6   :  { %3853 = vmatpush1.bf16.msra.mxu0 %v5502_v60  ;;  %3894 = vmatpush1.bf16.msra.mxu1 %v5505_v5  ;;  %v6658_v60 = vsub.s32 1, %v6372_v47  ;;  %v6661_v5 = vsub.s32 3, %v6372_v47 }
  0xc7   :  { %3854 = vmatprep.subr.bf16.mxu0 %v5510_v6  ;;  %3895 = vmatprep.subr.bf16.mxu1 %v5513_v7  ;;  %v129_v6 = vrot.slane %v122_v4, %v6649_v2  ;;  %v137_v7 = vrot.slane %v122_v4, %v6652_v3 }
  0xca   :  { %3855 = vmatpush1.bf16.msra.mxu0 %v5508_v8  ;;  %3896 = vmatpush1.bf16.msra.mxu1 %v5511_v9  ;;  %v133_v8 = vrot.slane %v122_v4, %v6658_v60  ;;  %v141_v9 = vrot.slane %v122_v4, %v6661_v5 }
  0xcb   :  { %3856 = vmatprep.subr.bf16.mxu0 %v5516_v10  ;;  %3897 = vmatprep.subr.bf16.mxu1 %v5519_v11 }
  0xce   :  { %3857 = vmatpush1.bf16.msra.mxu0 %v5514_v12  ;;  %3898 = vmatpush1.bf16.msra.mxu1 %v5517_v13 }
  0xcf   :  { %3858 = vmatprep.subr.bf16.mxu0 %v5522_v14  ;;  %3899 = vmatprep.subr.bf16.mxu1 %v5525_v15  ;;  %v144_v14 = vsub.s32 4, %v6372_v47  ;;  %v152_v15 = vsub.s32 6, %v6372_v47 }
  0xd2   :  { %3859 = vmatpush1.bf16.msra.mxu0 %v5520_v16  ;;  %3900 = vmatpush1.bf16.msra.mxu1 %v5523_v17 }
  0xd3   :  { %3860 = vmatprep.subr.bf16.mxu0 %v5528_v18  ;;  %3901 = vmatprep.subr.bf16.mxu1 %v5531_v19 }
  0xd6   :  { %3861 = vmatpush1.bf16.msra.mxu0 %v5526_v20  ;;  %3902 = vmatpush1.bf16.msra.mxu1 %v5529_v21  ;;  %v148_v20 = vsub.s32 5, %v6372_v47  ;;  %v156_v21 = vsub.s32 7, %v6372_v47 }
  0xd7   :  { %3862 = vmatprep.subr.bf16.mxu0 %v5534_v22  ;;  %3903 = vmatprep.subr.bf16.mxu1 %v5537_v23 }
  0xda   :  { %3863 = vmatpush1.bf16.msra.mxu0 %v5532_v24  ;;  %3904 = vmatpush1.bf16.msra.mxu1 %v5535_v25 }
  0xdb   :  { %3864 = vmatprep.subr.bf16.mxu0 %v5540_v26  ;;  %3905 = vmatprep.subr.bf16.mxu1 %v5543_v27  ;;  %v5592_v26 = vld [vmem:[%s8345_s3 + $0x4e0] ss:$16 sps:$4 sm:$0xff]  }
  0xdc   :  { %v5595_v27 = vld [vmem:[%s8345_s3 + $0x6e0] ss:$16 sps:$4 sm:$0xff]  }
  0xde   :  { %3865 = vmatpush1.bf16.msra.mxu0 %v5538_v28  ;;  %3906 = vmatpush1.bf16.msra.mxu1 %v5541_v29  ;;  %v145_v28 = vrot.slane %v122_v4, %v144_v14  ;;  %v153_v29 = vrot.slane %v122_v4, %v152_v15 }
  0xdf   :  { %3866 = vmatprep.subr.bf16.mxu0 %v5546_v30  ;;  %3907 = vmatprep.subr.bf16.mxu1 %v5549_v31 }
  0xe2   :  { %3867 = vmatpush2.bf16.msra.mxu0 %v5544_v32  ;;  %3908 = vmatpush2.bf16.msra.mxu1 %v5547_v33 }
  0xe3   :  { %3868 = vmatprep.subr.bf16.mxu0 %v5552_v34  ;;  %3909 = vmatprep.subr.bf16.mxu1 %v5555_v35  ;;  %v5600_v34 = vld [vmem:[%s8345_s3 + $0x4c4] ss:$16 sps:$4 sm:$0xff]  }
  0xe4   :  { %v5603_v35 = vld [vmem:[%s8345_s3 + $0x6c4] ss:$16 sps:$4 sm:$0xff]  }
  0xe6   :  { %3869 = vmatpush2.bf16.msra.mxu0 %v5550_v36  ;;  %3910 = vmatpush2.bf16.msra.mxu1 %v5553_v37  ;;  %v149_v36 = vrot.slane %v122_v4, %v148_v20  ;;  %v157_v37 = vrot.slane %v122_v4, %v156_v21 }
  0xe7   :  { %3870 = vmatprep.subr.bf16.mxu0 %v5558_v38  ;;  %3911 = vmatprep.subr.bf16.mxu1 %v5561_v39 }
  0xea   :  { %3871 = vmatpush2.bf16.msra.mxu0 %v5556_v40  ;;  %3912 = vmatpush2.bf16.msra.mxu1 %v5559_v41 }
  0xeb   :  { %3872 = vmatprep.subr.bf16.mxu0 %v5564_v42  ;;  %3913 = vmatprep.subr.bf16.mxu1 %v5567_v43  ;;  %v5598_v42 = vld [vmem:[%s8345_s3 + $0x4c0] ss:$16 sps:$4 sm:$0xff]  }
  0xec   :  { %v5601_v43 = vld [vmem:[%s8345_s3 + $0x6c0] ss:$16 sps:$4 sm:$0xff]  }
  0xee   :  { %3873 = vmatpush2.bf16.msra.mxu0 %v5562_v44  ;;  %3914 = vmatpush2.bf16.msra.mxu1 %v5565_v45  ;;  %v6728_v44 = vld [vmem:[%s8346_s2 + $0x8] sm:$0xff] }
  0xef   :  { %3874 = vmatprep.subr.bf16.mxu0 %v5570_v46  ;;  %3915 = vmatprep.subr.bf16.mxu1 %v5573_v48  ;;  %v5606_v48 = vld [vmem:[%s8345_s3 + $0x4a4] ss:$16 sps:$4 sm:$0xff]   ;;  %v173_v4 = vrot.slane %v6728_v44, %v6661_v5 }
  0xf2   :  { %3875 = vmatpush2.bf16.msra.mxu0 %v5568_v49  ;;  %3916 = vmatpush2.bf16.msra.mxu1 %v5571_v50  ;;  %v5609_v49 = vld [vmem:[%s8345_s3 + $0x6a4] ss:$16 sps:$4 sm:$0xff]  }
  0xf3   :  { %3876 = vmatprep.subr.bf16.mxu0 %v5576_v51  ;;  %3917 = vmatprep.subr.bf16.mxu1 %v5579_v52 }
  0xf6   :  { %3877 = vmatpush2.bf16.msra.mxu0 %v5574_v53  ;;  %3918 = vmatpush2.bf16.msra.mxu1 %v5577_v54  ;;  %v161_v54 = vrot.slane %v6728_v44, %v6649_v2 }
  0xf7   :  { %3878 = vmatprep.subr.bf16.mxu0 %v5582_v55  ;;  %3919 = vmatprep.subr.bf16.mxu1 %v5585_v56 }
  0xfa   :  { %3879 = vmatpush2.bf16.msra.mxu0 %v5580_v57  ;;  %3920 = vmatpush2.bf16.msra.mxu1 %v5583_v58  ;;  %v5604_v57 = vld [vmem:[%s8345_s3 + $0x4a0] ss:$16 sps:$4 sm:$0xff]  }
  0xfb   :  { %3880 = vmatprep.subr.bf16.mxu0 %v5588_v59  ;;  %3921 = vmatprep.subr.bf16.mxu1 %v5591_v61  ;;  %v5607_v58 = vld [vmem:[%s8345_s3 + $0x6a0] ss:$16 sps:$4 sm:$0xff]   ;;  %v169_v59 = vrot.slane %v6728_v44, %v6652_v3 }
  0xfe   :  { %3881 = vmatpush2.bf16.msra.mxu0 %v5586_v62  ;;  %3922 = vmatpush2.bf16.msra.mxu1 %v5589_v63  ;;  %v5612_v63 = vld [vmem:[%s8345_s3 + $0x484] ss:$16 sps:$4 sm:$0xff]  }
  0xff   :  { %3932 = vmatprep.subr.bf16.mxu0 %v5594_v0  ;;  %3973 = vmatprep.subr.bf16.mxu1 %v5597_v1  ;;  %v5615_v0 = vld [vmem:[%s8345_s3 + $0x684] ss:$16 sps:$4 sm:$0xff]   ;;  %v165_v1 = vrot.slane %v6728_v44, %v6658_v60 }
 0x169   :  { %v430_v10 = vpop.f32.mrf.mxu0  ;;  %v471_v11 = vpop.f32.mrf.mxu1 }
 0x16a   :  { %v431_v12 = vadd.f32 %v430_v10, %v129_v6  ;;  %v472_v13 = vadd.f32 %v471_v11, %v137_v7  ;;  %v5610_v10 = vld [vmem:[%s8345_s3 + $0x480] ss:$16 sps:$4 sm:$0xff]  }
 0x16b   :  { %v432_v16 = vpop.f32.mrf.mxu0  ;;  %v473_v17 = vpop.f32.mrf.mxu1  ;;  %v5613_v11 = vld [vmem:[%s8345_s3 + $0x680] ss:$16 sps:$4 sm:$0xff]  }
 0x16c   :  { %724 = vst [vmem:[%s8347_s7] sm:$0xff] %v431_v12  ;;  %726 = vst [vmem:[%s8347_s7 + $0x10] sm:$0xff] %v472_v13  ;;  %v433_v18 = vadd.f32 %v432_v16, %v133_v8  ;;  %v474_v19 = vadd.f32 %v473_v17, %v141_v9  ;;  %v6697_v30 = vpack.c.bf16 %v431_v12, %v431_v12  ;;  %v5618_v16 = vld [vmem:[%s8345_s3 + $0x464] ss:$16 sps:$4 sm:$0xff]  }
 0x16d   :  { %v434_v22 = vpop.f32.mrf.mxu0  ;;  %v475_v23 = vpop.f32.mrf.mxu1  ;;  %v6699_v31 = vpack.c.bf16 %v472_v13, %v472_v13  ;;  %v5621_v17 = vld [vmem:[%s8345_s3 + $0x664] ss:$16 sps:$4 sm:$0xff]  }
 0x16e   :  { %725 = vst [vmem:[%s8347_s7 + $0x8] sm:$0xff] %v433_v18  ;;  %v6680_v24 = vpack.c.bf16 %v433_v18, %v433_v18  ;;  %727 = vst [vmem:[%s8347_s7 + $0x18] sm:$0xff] %v474_v19  ;;  %v6685_v25 = vpack.c.bf16 %v474_v19, %v474_v19 }
 0x16f   :  { %v435_v32 = vpop.f32.mrf.mxu0  ;;  %v476_v33 = vpop.f32.mrf.mxu1 }
 0x170   :  { %3882 = vmatprep.mubr.bf16.mxu0 %v6680_v24  ;;  %3923 = vmatprep.mubr.bf16.mxu1 %v6685_v25 }
 0x171   :  { %v512_v38 = vpop.f32.mrf.mxu0  ;;  %v553_v39 = vpop.f32.mrf.mxu1  ;;  %3883 = vmatmul.mubr.bf16.vlgmr.msra.gmra.mxu0 %v6697_v30  ;;  %3924 = vmatmul.mubr.bf16.vlgmr.msra.gmra.mxu1 %v6699_v31 }
 0x172   :  { %v6715_v40 = vadd.f32 %v512_v38, %v145_v28  ;;  %v6717_v41 = vadd.f32 %v553_v39, %v153_v29  ;;  %3933 = vmatpush1.bf16.msra.mxu0 %v5592_v26  ;;  %3974 = vmatpush1.bf16.msra.mxu1 %v5595_v27  ;;  %v5616_v26 = vld [vmem:[%s8345_s3 + $0x460] ss:$16 sps:$4 sm:$0xff]   ;;  %v177_v28 = vrot.slane %v6728_v44, %v144_v14 }
 0x173   :  { %v514_v45 = vpop.f32.mrf.mxu0  ;;  %v555_v46 = vpop.f32.mrf.mxu1  ;;  %3934 = vmatprep.subr.bf16.mxu0 %v5600_v34  ;;  %3975 = vmatprep.subr.bf16.mxu1 %v5603_v35  ;;  %v5619_v27 = vld [vmem:[%s8345_s3 + $0x660] ss:$16 sps:$4 sm:$0xff]   ;;  %v185_v29 = vrot.slane %v6728_v44, %v152_v15  ;;  %v5624_v34 = vld [vmem:[%s8345_s3 + $0x444] ss:$16 sps:$4 sm:$0xff]   ;;  %v181_v14 = vrot.slane %v6728_v44, %v148_v20  ;;  %v189_v15 = vrot.slane %v6728_v44, %v156_v21 }
 0x174   :  { %728 = vst [vmem:[%s8347_s7 + $0x20] sm:$0xff] %v6715_v40  ;;  %730 = vst [vmem:[%s8347_s7 + $0x30] sm:$0xff] %v6717_v41  ;;  %v515_v50 = vadd.f32 %v514_v45, %v149_v36  ;;  %v556_v51 = vadd.f32 %v555_v46, %v157_v37  ;;  %v5627_v35 = vld [vmem:[%s8345_s3 + $0x644] ss:$16 sps:$4 sm:$0xff]   ;;  %v5625_v20 = vld [vmem:[%s8345_s3 + $0x640] ss:$16 sps:$4 sm:$0xff]  }
 0x175   :  { %v516_v52 = vpop.f32.mrf.mxu0  ;;  %v557_v53 = vpop.f32.mrf.mxu1  ;;  %v5630_v21 = vld [vmem:[%s8345_s3 + $0x424] ss:$16 sps:$4 sm:$0xff]  }
 0x176   :  { %729 = vst [vmem:[%s8347_s7 + $0x28] sm:$0xff] %v515_v50  ;;  %v6749_v55 = vpack.c.bf16 %v515_v50, %v515_v50  ;;  %731 = vst [vmem:[%s8347_s7 + $0x38] sm:$0xff] %v556_v51  ;;  %v6754_v56 = vpack.c.bf16 %v556_v51, %v556_v51  ;;  %3935 = vmatpush1.bf16.msra.mxu0 %v5598_v42  ;;  %3976 = vmatpush1.bf16.msra.mxu1 %v5601_v43  ;;  %v5622_v42 = vld [vmem:[%s8345_s3 + $0x440] ss:$16 sps:$4 sm:$0xff]   ;;  %v5633_v44 = vld [vmem:[%s8345_s3 + $0x624] ss:$16 sps:$4 sm:$0xff]  }
 0x177   :  { %v517_v61 = vpop.f32.mrf.mxu0  ;;  %v558_v62 = vpop.f32.mrf.mxu1  ;;  %3936 = vmatprep.subr.bf16.mxu0 %v5606_v48  ;;  %3977 = vmatprep.subr.bf16.mxu1 %v5609_v49  ;;  %v5628_v50 = vld [vmem:[%s8345_s3 + $0x420] ss:$16 sps:$4 sm:$0xff]  }
 0x178   :  { %3964 = vmatprep.mubr.bf16.mxu0 %v6749_v55  ;;  %4005 = vmatprep.mubr.bf16.mxu1 %v6754_v56  ;;  %v5631_v51 = vld [vmem:[%s8345_s3 + $0x620] ss:$16 sps:$4 sm:$0xff]   ;;  %v5642_v61 = vld [vmem:[%s8345_s3 + $0x5e4] ss:$16 sps:$4 sm:$0xff]  }
 0x179   :  { %v594_v6 = vpop.f32.mrf.mxu0  ;;  %v635_v7 = vpop.f32.mrf.mxu1  ;;  %v5645_v62 = vld [vmem:[%s8345_s3 + $0x7e4] ss:$16 sps:$4 sm:$0xff]  }
 0x17a   :  { %v6776_v8 = vadd.f32 %v594_v6, %v161_v54  ;;  %v6778_v9 = vadd.f32 %v635_v7, %v169_v59  ;;  %3937 = vmatpush1.bf16.msra.mxu0 %v5604_v57  ;;  %3978 = vmatpush1.bf16.msra.mxu1 %v5607_v58  ;;  %v5636_v54 = vld [vmem:[%s8345_s3 + $0x404] ss:$16 sps:$4 sm:$0xff]   ;;  %v5634_v58 = vld [vmem:[%s8345_s3 + $0x400] ss:$16 sps:$4 sm:$0xff]  }
 0x17b   :  { %v596_v12 = vpop.f32.mrf.mxu0  ;;  %v637_v13 = vpop.f32.mrf.mxu1  ;;  %3938 = vmatprep.subr.bf16.mxu0 %v5612_v63  ;;  %3979 = vmatprep.subr.bf16.mxu1 %v5615_v0  ;;  %v5639_v57 = vld [vmem:[%s8345_s3 + $0x604] ss:$16 sps:$4 sm:$0xff]   ;;  %v5637_v59 = vld [vmem:[%s8345_s3 + $0x600] ss:$16 sps:$4 sm:$0xff]  }
 0x17c   :  { %732 = vst [vmem:[%s8347_s7 + $0x40] sm:$0xff] %v6776_v8  ;;  %734 = vst [vmem:[%s8347_s7 + $0x50] sm:$0xff] %v6778_v9  ;;  %v6800_v18 = vadd.f32 %v596_v12, %v165_v1  ;;  %v6802_v19 = vadd.f32 %v637_v13, %v173_v4  ;;  %v5640_v63 = vld [vmem:[%s8345_s3 + $0x5e0] ss:$16 sps:$4 sm:$0xff]   ;;  %v5648_v1 = vld [vmem:[%s8345_s3 + $0x5c4] ss:$16 sps:$4 sm:$0xff]  }
 0x17d   :  { %v598_v22 = vpop.f32.mrf.mxu0  ;;  %v639_v23 = vpop.f32.mrf.mxu1  ;;  %v5643_v0 = vld [vmem:[%s8345_s3 + $0x7e0] ss:$16 sps:$4 sm:$0xff]   ;;  %v5651_v4 = vld [vmem:[%s8345_s3 + $0x7c4] ss:$16 sps:$4 sm:$0xff]  }
 0x17e   :  { %733 = vst [vmem:[%s8347_s7 + $0x48] sm:$0xff] %v6800_v18  ;;  %735 = vst [vmem:[%s8347_s7 + $0x58] sm:$0xff] %v6802_v19  ;;  %3939 = vmatpush1.bf16.msra.mxu0 %v5610_v10  ;;  %3980 = vmatpush1.bf16.msra.mxu1 %v5613_v11  ;;  %v5646_v6 = vld [vmem:[%s8345_s3 + $0x5c0] ss:$16 sps:$4 sm:$0xff]   ;;  %v5654_v10 = vld [vmem:[%s8345_s3 + $0x5a4] ss:$16 sps:$4 sm:$0xff]  }
 0x17f   :  { %v599_v32 = vpop.f32.mrf.mxu0  ;;  %v640_v33 = vpop.f32.mrf.mxu1  ;;  %3940 = vmatprep.subr.bf16.mxu0 %v5618_v16  ;;  %3981 = vmatprep.subr.bf16.mxu1 %v5621_v17  ;;  %v5649_v7 = vld [vmem:[%s8345_s3 + $0x7c0] ss:$16 sps:$4 sm:$0xff]   ;;  %v5657_v11 = vld [vmem:[%s8345_s3 + $0x7a4] ss:$16 sps:$4 sm:$0xff]  }
 0x180   :  { %v5652_v12 = vld [vmem:[%s8345_s3 + $0x5a0] ss:$16 sps:$4 sm:$0xff]   ;;  %v5660_v16 = vld [vmem:[%s8345_s3 + $0x584] ss:$16 sps:$4 sm:$0xff]  }
 0x181   :  { %v676_v36 = vpop.f32.mrf.mxu0  ;;  %v717_v37 = vpop.f32.mrf.mxu1  ;;  %v5655_v13 = vld [vmem:[%s8345_s3 + $0x7a0] ss:$16 sps:$4 sm:$0xff]   ;;  %v5663_v17 = vld [vmem:[%s8345_s3 + $0x784] ss:$16 sps:$4 sm:$0xff]  }
 0x182   :  { %v6836_v38 = vadd.f32 %v676_v36, %v177_v28  ;;  %v6838_v39 = vadd.f32 %v717_v37, %v185_v29  ;;  %3941 = vmatpush1.bf16.msra.mxu0 %v5616_v26  ;;  %3982 = vmatpush1.bf16.msra.mxu1 %v5619_v27  ;;  %v5658_v22 = vld [vmem:[%s8345_s3 + $0x580] ss:$16 sps:$4 sm:$0xff]   ;;  %v5666_v26 = vld [vmem:[%s8345_s3 + $0x564] ss:$16 sps:$4 sm:$0xff]  }
 0x183   :  { %v678_v43 = vpop.f32.mrf.mxu0  ;;  %v719_v47 = vpop.f32.mrf.mxu1  ;;  %3942 = vmatprep.subr.bf16.mxu0 %v5624_v34  ;;  %3983 = vmatprep.subr.bf16.mxu1 %v5627_v35  ;;  %v5661_v23 = vld [vmem:[%s8345_s3 + $0x780] ss:$16 sps:$4 sm:$0xff]   ;;  %v5669_v27 = vld [vmem:[%s8345_s3 + $0x764] ss:$16 sps:$4 sm:$0xff]  }
 0x184   :  { %736 = vst [vmem:[%s8347_s7 + $0x60] sm:$0xff] %v6836_v38  ;;  %738 = vst [vmem:[%s8347_s7 + $0x70] sm:$0xff] %v6838_v39  ;;  %v6860_v45 = vadd.f32 %v678_v43, %v181_v14  ;;  %v6862_v46 = vadd.f32 %v719_v47, %v189_v15  ;;  %v5664_v28 = vld [vmem:[%s8345_s3 + $0x560] ss:$16 sps:$4 sm:$0xff]   ;;  %v5672_v32 = vld [vmem:[%s8345_s3 + $0x544] ss:$16 sps:$4 sm:$0xff]  }
 0x185   :  { %v680_v48 = vpop.f32.mrf.mxu0  ;;  %v721_v49 = vpop.f32.mrf.mxu1  ;;  %v5667_v29 = vld [vmem:[%s8345_s3 + $0x760] ss:$16 sps:$4 sm:$0xff]   ;;  %v5675_v33 = vld [vmem:[%s8345_s3 + $0x744] ss:$16 sps:$4 sm:$0xff]  }
 0x186   :  { %737 = vst [vmem:[%s8347_s7 + $0x68] sm:$0xff] %v6860_v45  ;;  %739 = vst [vmem:[%s8347_s7 + $0x78] sm:$0xff] %v6862_v46  ;;  %3943 = vmatpush1.bf16.msra.mxu0 %v5622_v42  ;;  %3984 = vmatpush1.bf16.msra.mxu1 %v5625_v20  ;;  %v5670_v34 = vld [vmem:[%s8345_s3 + $0x540] ss:$16 sps:$4 sm:$0xff]   ;;  %v5678_v14 = vld [vmem:[%s8345_s3 + $0x524] ss:$16 sps:$4 sm:$0xff]   ;;  %v6997_v49 = vpack.c.bf16 %v6715_v40, %v6715_v40 }
 0x187   :  { %v681_v52 = vpop.f32.mrf.mxu0  ;;  %v722_v53 = vpop.f32.mrf.mxu1  ;;  %3944 = vmatprep.subr.bf16.mxu0 %v5630_v21  ;;  %3985 = vmatprep.subr.bf16.mxu1 %v5633_v44  ;;  %v5673_v35 = vld [vmem:[%s8345_s3 + $0x740] ss:$16 sps:$4 sm:$0xff]   ;;  %v5681_v15 = vld [vmem:[%s8345_s3 + $0x724] ss:$16 sps:$4 sm:$0xff]  }
 0x188   :  { %v5676_v36 = vld [vmem:[%s8345_s3 + $0x520] ss:$16 sps:$4 sm:$0xff]   ;;  %v5684_v42 = vld [vmem:[%s8345_s3 + $0x504] ss:$16 sps:$4 sm:$0xff]   ;;  %v7008_v52 = vpack.c.bf16 %v6800_v18, %v6800_v18 }
 0x189   :  { %v5679_v37 = vld [vmem:[%s8345_s3 + $0x720] ss:$16 sps:$4 sm:$0xff]   ;;  %v5687_v20 = vld [vmem:[%s8345_s3 + $0x704] ss:$16 sps:$4 sm:$0xff]  }
 0x18a   :  { %3945 = vmatpush1.bf16.msra.mxu0 %v5628_v50  ;;  %3986 = vmatpush1.bf16.msra.mxu1 %v5631_v51  ;;  %v5682_v43 = vld [vmem:[%s8345_s3 + $0x500] ss:$16 sps:$4 sm:$0xff]   ;;  %v5690_v21 = vld [vmem:[%s8345_s3 + $0x8e4] ss:$16 sps:$4 sm:$0xff]   ;;  %v7001_v50 = vpack.c.bf16 %v6717_v41, %v6717_v41  ;;  %v7018_v41 = vpack.c.bf16 %v6802_v19, %v6802_v19 }
 0x18b   :  { %3946 = vmatprep.subr.bf16.mxu0 %v5636_v54  ;;  %3987 = vmatprep.subr.bf16.mxu1 %v5639_v57  ;;  %v5685_v47 = vld [vmem:[%s8345_s3 + $0x700] ss:$16 sps:$4 sm:$0xff]   ;;  %v5693_v44 = vld [vmem:[%s8345_s3 + $0xae4] ss:$16 sps:$4 sm:$0xff]  }
 0x18c   :  { %v5688_v48 = vld [vmem:[%s8345_s3 + $0x8e0] ss:$16 sps:$4 sm:$0xff]   ;;  %v5696_v53 = vld [vmem:[%s8345_s3 + $0x8c4] ss:$16 sps:$4 sm:$0xff]  }
 0x18d   :  { %v5691_v51 = vld [vmem:[%s8345_s3 + $0xae0] ss:$16 sps:$4 sm:$0xff]   ;;  %v5699_v40 = vld [vmem:[%s8345_s3 + $0xac4] ss:$16 sps:$4 sm:$0xff]  }
 0x18e   :  { %3947 = vmatpush1.bf16.msra.mxu0 %v5634_v58  ;;  %3988 = vmatpush1.bf16.msra.mxu1 %v5637_v59  ;;  %v5694_v18 = vld [vmem:[%s8345_s3 + $0x8c0] ss:$16 sps:$4 sm:$0xff]   ;;  %v5702_v19 = vld [vmem:[%s8345_s3 + $0x8a4] ss:$16 sps:$4 sm:$0xff]  }
 0x18f   :  { %3948 = vmatprep.subr.bf16.mxu0 %v5642_v61  ;;  %3989 = vmatprep.subr.bf16.mxu1 %v5645_v62  ;;  %v5697_v54 = vld [vmem:[%s8345_s3 + $0xac0] ss:$16 sps:$4 sm:$0xff]   ;;  %v5705_v57 = vld [vmem:[%s8345_s3 + $0xaa4] ss:$16 sps:$4 sm:$0xff]  }
 0x190   :  { %v5700_v58 = vld [vmem:[%s8345_s3 + $0x8a0] ss:$16 sps:$4 sm:$0xff]   ;;  %v5708_v61 = vld [vmem:[%s8345_s3 + $0x884] ss:$16 sps:$4 sm:$0xff]  }
 0x191   :  { %v5703_v59 = vld [vmem:[%s8345_s3 + $0xaa0] ss:$16 sps:$4 sm:$0xff]   ;;  %v5711_v62 = vld [vmem:[%s8345_s3 + $0xa84] ss:$16 sps:$4 sm:$0xff]  }
 0x192   :  { %3949 = vmatpush2.bf16.msra.mxu0 %v5640_v63  ;;  %3990 = vmatpush2.bf16.msra.mxu1 %v5643_v0  ;;  %v5706_v63 = vld [vmem:[%s8345_s3 + $0x880] ss:$16 sps:$4 sm:$0xff]  }
 0x193   :  { %3950 = vmatprep.subr.bf16.mxu0 %v5648_v1  ;;  %3991 = vmatprep.subr.bf16.mxu1 %v5651_v4  ;;  %v5709_v0 = vld [vmem:[%s8345_s3 + $0xa80] ss:$16 sps:$4 sm:$0xff]   ;;  %v5714_v1 = vld [vmem:[%s8345_s3 + $0x864] ss:$16 sps:$4 sm:$0xff]  }
 0x194   :  { %v5717_v4 = vld [vmem:[%s8345_s3 + $0xa64] ss:$16 sps:$4 sm:$0xff]  }
 0x196   :  { %3951 = vmatpush2.bf16.msra.mxu0 %v5646_v6  ;;  %3992 = vmatpush2.bf16.msra.mxu1 %v5649_v7  ;;  %v5712_v6 = vld [vmem:[%s8345_s3 + $0x860] ss:$16 sps:$4 sm:$0xff]  }
 0x197   :  { %3952 = vmatprep.subr.bf16.mxu0 %v5654_v10  ;;  %3993 = vmatprep.subr.bf16.mxu1 %v5657_v11  ;;  %v5715_v7 = vld [vmem:[%s8345_s3 + $0xa60] ss:$16 sps:$4 sm:$0xff]   ;;  %v5720_v10 = vld [vmem:[%s8345_s3 + $0x844] ss:$16 sps:$4 sm:$0xff]  }
 0x198   :  { %v5723_v11 = vld [vmem:[%s8345_s3 + $0xa44] ss:$16 sps:$4 sm:$0xff]  }
 0x19a   :  { %3953 = vmatpush2.bf16.msra.mxu0 %v5652_v12  ;;  %3994 = vmatpush2.bf16.msra.mxu1 %v5655_v13  ;;  %v5718_v12 = vld [vmem:[%s8345_s3 + $0x840] ss:$16 sps:$4 sm:$0xff]  }
 0x19b   :  { %3954 = vmatprep.subr.bf16.mxu0 %v5660_v16  ;;  %3995 = vmatprep.subr.bf16.mxu1 %v5663_v17  ;;  %v5721_v13 = vld [vmem:[%s8345_s3 + $0xa40] ss:$16 sps:$4 sm:$0xff]   ;;  %v5726_v16 = vld [vmem:[%s8345_s3 + $0x824] ss:$16 sps:$4 sm:$0xff]  }
 0x19c   :  { %v5729_v17 = vld [vmem:[%s8345_s3 + $0xa24] ss:$16 sps:$4 sm:$0xff]  }
 0x19e   :  { %3955 = vmatpush2.bf16.msra.mxu0 %v5658_v22  ;;  %3996 = vmatpush2.bf16.msra.mxu1 %v5661_v23  ;;  %v5724_v22 = vld [vmem:[%s8345_s3 + $0x820] ss:$16 sps:$4 sm:$0xff]  }
 0x19f   :  { %3956 = vmatprep.subr.bf16.mxu0 %v5666_v26  ;;  %3997 = vmatprep.subr.bf16.mxu1 %v5669_v27  ;;  %v5727_v23 = vld [vmem:[%s8345_s3 + $0xa20] ss:$16 sps:$4 sm:$0xff]   ;;  %v5732_v26 = vld [vmem:[%s8345_s3 + $0x804] ss:$16 sps:$4 sm:$0xff]  }
 0x1a0   :  { %v5735_v27 = vld [vmem:[%s8345_s3 + $0xa04] ss:$16 sps:$4 sm:$0xff]  }
 0x1a2   :  { %3957 = vmatpush2.bf16.msra.mxu0 %v5664_v28  ;;  %3998 = vmatpush2.bf16.msra.mxu1 %v5667_v29  ;;  %v5730_v28 = vld [vmem:[%s8345_s3 + $0x800] ss:$16 sps:$4 sm:$0xff]  }
 0x1a3   :  { %3958 = vmatprep.subr.bf16.mxu0 %v5672_v32  ;;  %3999 = vmatprep.subr.bf16.mxu1 %v5675_v33  ;;  %v5733_v29 = vld [vmem:[%s8345_s3 + $0xa00] ss:$16 sps:$4 sm:$0xff]   ;;  %v5738_v32 = vld [vmem:[%s8345_s3 + $0x9e4] ss:$16 sps:$4 sm:$0xff]  }
 0x1a4   :  { %v5741_v33 = vld [vmem:[%s8345_s3 + $0xbe4] ss:$16 sps:$4 sm:$0xff]  }
 0x1a6   :  { %3959 = vmatpush2.bf16.msra.mxu0 %v5670_v34  ;;  %4000 = vmatpush2.bf16.msra.mxu1 %v5673_v35  ;;  %v5736_v34 = vld [vmem:[%s8345_s3 + $0x9e0] ss:$16 sps:$4 sm:$0xff]  }
 0x1a7   :  { %3960 = vmatprep.subr.bf16.mxu0 %v5678_v14  ;;  %4001 = vmatprep.subr.bf16.mxu1 %v5681_v15  ;;  %v5739_v35 = vld [vmem:[%s8345_s3 + $0xbe0] ss:$16 sps:$4 sm:$0xff]   ;;  %v5744_v14 = vld [vmem:[%s8345_s3 + $0x9c4] ss:$16 sps:$4 sm:$0xff]  }
 0x1a8   :  { %v5747_v15 = vld [vmem:[%s8345_s3 + $0xbc4] ss:$16 sps:$4 sm:$0xff]  }
 0x1aa   :  { %3961 = vmatpush2.bf16.msra.mxu0 %v5676_v36  ;;  %4002 = vmatpush2.bf16.msra.mxu1 %v5679_v37  ;;  %v5742_v36 = vld [vmem:[%s8345_s3 + $0x9c0] ss:$16 sps:$4 sm:$0xff]  }
 0x1ab   :  { %3962 = vmatprep.subr.bf16.mxu0 %v5684_v42  ;;  %4003 = vmatprep.subr.bf16.mxu1 %v5687_v20  ;;  %v5745_v37 = vld [vmem:[%s8345_s3 + $0xbc0] ss:$16 sps:$4 sm:$0xff]   ;;  %v5750_v42 = vld [vmem:[%s8345_s3 + $0x9a4] ss:$16 sps:$4 sm:$0xff]  }
 0x1ac   :  { %v5753_v20 = vld [vmem:[%s8345_s3 + $0xba4] ss:$16 sps:$4 sm:$0xff]  }
 0x1ae   :  { %3963 = vmatpush2.bf16.msra.mxu0 %v5682_v43  ;;  %4004 = vmatpush2.bf16.msra.mxu1 %v5685_v47  ;;  %v5748_v43 = vld [vmem:[%s8345_s3 + $0x9a0] ss:$16 sps:$4 sm:$0xff]  }
 0x1af   :  { %4014 = vmatprep.subr.bf16.mxu0 %v5690_v21  ;;  %4055 = vmatprep.subr.bf16.mxu1 %v5693_v44  ;;  %v5751_v47 = vld [vmem:[%s8345_s3 + $0xba0] ss:$16 sps:$4 sm:$0xff]   ;;  %v5756_v21 = vld [vmem:[%s8345_s3 + $0x984] ss:$16 sps:$4 sm:$0xff]  }
 0x1b0   :  { %v5759_v44 = vld [vmem:[%s8345_s3 + $0xb84] ss:$16 sps:$4 sm:$0xff]  }
 0x1b1   :  { %3965 = vmatmul.mubr.bf16.vlgmr.msra.gmra.mxu0 %v6997_v49  ;;  %4006 = vmatmul.mubr.bf16.vlgmr.msra.gmra.mxu1 %v7001_v50 }
 0x1b2   :  { %4015 = vmatpush1.bf16.msra.mxu0 %v5688_v48  ;;  %4046 = vmatprep.mubr.bf16.mxu0 %v7008_v52  ;;  %v5754_v48 = vld [vmem:[%s8345_s3 + $0x980] ss:$16 sps:$4 sm:$0xff]  }
 0x1b3   :  { %4056 = vmatpush1.bf16.msra.mxu1 %v5691_v51  ;;  %4087 = vmatprep.mubr.bf16.mxu1 %v7018_v41  ;;  %v5757_v51 = vld [vmem:[%s8345_s3 + $0xb80] ss:$16 sps:$4 sm:$0xff]  }
 0x1b4   :  { %4016 = vmatprep.subr.bf16.mxu0 %v5696_v53  ;;  %4057 = vmatprep.subr.bf16.mxu1 %v5699_v40  ;;  %v5762_v53 = vld [vmem:[%s8345_s3 + $0x964] ss:$16 sps:$4 sm:$0xff]  }
 0x1b5   :  { %v5765_v40 = vld [vmem:[%s8345_s3 + $0xb64] ss:$16 sps:$4 sm:$0xff]  }
 0x1b6   :  { %4017 = vmatpush1.bf16.msra.mxu0 %v5694_v18  ;;  %v5760_v18 = vld [vmem:[%s8345_s3 + $0x960] ss:$16 sps:$4 sm:$0xff]  }
 0x1b7   :  { %4058 = vmatpush1.bf16.msra.mxu1 %v5697_v54  ;;  %4018 = vmatprep.subr.bf16.mxu0 %v5702_v19  ;;  %v5763_v54 = vld [vmem:[%s8345_s3 + $0xb60] ss:$16 sps:$4 sm:$0xff]   ;;  %v5768_v19 = vld [vmem:[%s8345_s3 + $0x944] ss:$16 sps:$4 sm:$0xff]  }
 0x1b8   :  { %4059 = vmatprep.subr.bf16.mxu1 %v5705_v57  ;;  %v5771_v57 = vld [vmem:[%s8345_s3 + $0xb44] ss:$16 sps:$4 sm:$0xff]  }
 0x1ba   :  { %4019 = vmatpush1.bf16.msra.mxu0 %v5700_v58  ;;  %v5766_v58 = vld [vmem:[%s8345_s3 + $0x940] ss:$16 sps:$4 sm:$0xff]  }
 0x1bb   :  { %4060 = vmatpush1.bf16.msra.mxu1 %v5703_v59  ;;  %4020 = vmatprep.subr.bf16.mxu0 %v5708_v61  ;;  %v5769_v59 = vld [vmem:[%s8345_s3 + $0xb40] ss:$16 sps:$4 sm:$0xff]   ;;  %v5774_v61 = vld [vmem:[%s8345_s3 + $0x924] ss:$16 sps:$4 sm:$0xff]  }
 0x1bc   :  { %4061 = vmatprep.subr.bf16.mxu1 %v5711_v62  ;;  %v5777_v62 = vld [vmem:[%s8345_s3 + $0xb24] ss:$16 sps:$4 sm:$0xff]  }
 0x1be   :  { %4021 = vmatpush1.bf16.msra.mxu0 %v5706_v63  ;;  %v5772_v63 = vld [vmem:[%s8345_s3 + $0x920] ss:$16 sps:$4 sm:$0xff]  }
 0x1bf   :  { %4062 = vmatpush1.bf16.msra.mxu1 %v5709_v0  ;;  %4022 = vmatprep.subr.bf16.mxu0 %v5714_v1  ;;  %v5775_v0 = vld [vmem:[%s8345_s3 + $0xb20] ss:$16 sps:$4 sm:$0xff]   ;;  %v5780_v1 = vld [vmem:[%s8345_s3 + $0x904] ss:$16 sps:$4 sm:$0xff]  }
 0x1c0   :  { %4063 = vmatprep.subr.bf16.mxu1 %v5717_v4  ;;  %v5783_v4 = vld [vmem:[%s8345_s3 + $0xb04] ss:$16 sps:$4 sm:$0xff]  }
 0x1c2   :  { %4023 = vmatpush1.bf16.msra.mxu0 %v5712_v6  ;;  %v5778_v6 = vld [vmem:[%s8345_s3 + $0x900] ss:$16 sps:$4 sm:$0xff]  }
 0x1c3   :  { %4064 = vmatpush1.bf16.msra.mxu1 %v5715_v7  ;;  %4024 = vmatprep.subr.bf16.mxu0 %v5720_v10  ;;  %v5781_v7 = vld [vmem:[%s8345_s3 + $0xb00] ss:$16 sps:$4 sm:$0xff]   ;;  %v5786_v10 = vld [vmem:[%s8345_s3 + $0xce4] ss:$16 sps:$4 sm:$0xff]  }
 0x1c4   :  { %4065 = vmatprep.subr.bf16.mxu1 %v5723_v11  ;;  %v5789_v11 = vld [vmem:[%s8345_s3 + $0xee4] ss:$16 sps:$4 sm:$0xff]  }
 0x1c6   :  { %4025 = vmatpush1.bf16.msra.mxu0 %v5718_v12  ;;  %v5784_v12 = vld [vmem:[%s8345_s3 + $0xce0] ss:$16 sps:$4 sm:$0xff]  }
 0x1c7   :  { %4066 = vmatpush1.bf16.msra.mxu1 %v5721_v13  ;;  %4026 = vmatprep.subr.bf16.mxu0 %v5726_v16  ;;  %v7209_v13 = vpack.c.bf16 %v6776_v8, %v6776_v8  ;;  %v5787_v16 = vld [vmem:[%s8345_s3 + $0xee0] ss:$16 sps:$4 sm:$0xff]   ;;  %v5795_v8 = vld [vmem:[%s8345_s3 + $0xec4] ss:$16 sps:$4 sm:$0xff]  }
 0x1c8   :  { %4067 = vmatprep.subr.bf16.mxu1 %v5729_v17  ;;  %v7216_v17 = vpack.c.bf16 %v6778_v9, %v6778_v9  ;;  %v5790_v9 = vld [vmem:[%s8345_s3 + $0xcc0] ss:$16 sps:$4 sm:$0xff]  }
 0x1ca   :  { %4027 = vmatpush1.bf16.msra.mxu0 %v5724_v22  ;;  %v5792_v22 = vld [vmem:[%s8345_s3 + $0xcc4] ss:$16 sps:$4 sm:$0xff]  }
 0x1cb   :  { %4068 = vmatpush1.bf16.msra.mxu1 %v5727_v23  ;;  %4028 = vmatprep.subr.bf16.mxu0 %v5732_v26  ;;  %v7223_v23 = vpack.c.bf16 %v6860_v45, %v6860_v45  ;;  %v7231_v26 = vpack.c.bf16 %v6862_v46, %v6862_v46  ;;  %v5793_v45 = vld [vmem:[%s8345_s3 + $0xec0] ss:$16 sps:$4 sm:$0xff]   ;;  %v5801_v46 = vld [vmem:[%s8345_s3 + $0xea4] ss:$16 sps:$4 sm:$0xff]  }
 0x1cc   :  { %4069 = vmatprep.subr.bf16.mxu1 %v5735_v27  ;;  %v5798_v27 = vld [vmem:[%s8345_s3 + $0xca4] ss:$16 sps:$4 sm:$0xff]  }
 0x1ce   :  { %4029 = vmatpush1.bf16.msra.mxu0 %v5730_v28  ;;  %v5796_v28 = vld [vmem:[%s8345_s3 + $0xca0] ss:$16 sps:$4 sm:$0xff]  }
 0x1cf   :  { %4070 = vmatpush1.bf16.msra.mxu1 %v5733_v29  ;;  %4030 = vmatprep.subr.bf16.mxu0 %v5738_v32  ;;  %v5799_v29 = vld [vmem:[%s8345_s3 + $0xea0] ss:$16 sps:$4 sm:$0xff]   ;;  %v5804_v32 = vld [vmem:[%s8345_s3 + $0xc84] ss:$16 sps:$4 sm:$0xff]  }
 0x1d0   :  { %4071 = vmatprep.subr.bf16.mxu1 %v5741_v33  ;;  %v5807_v33 = vld [vmem:[%s8345_s3 + $0xe84] ss:$16 sps:$4 sm:$0xff]  }
 0x1d2   :  { %4031 = vmatpush2.bf16.msra.mxu0 %v5736_v34  ;;  %v5802_v34 = vld [vmem:[%s8345_s3 + $0xc80] ss:$16 sps:$4 sm:$0xff]  }
 0x1d3   :  { %4072 = vmatpush2.bf16.msra.mxu1 %v5739_v35  ;;  %4032 = vmatprep.subr.bf16.mxu0 %v5744_v14  ;;  %v5805_v35 = vld [vmem:[%s8345_s3 + $0xe80] ss:$16 sps:$4 sm:$0xff]   ;;  %v5810_v14 = vld [vmem:[%s8345_s3 + $0xc64] ss:$16 sps:$4 sm:$0xff]  }
 0x1d4   :  { %4073 = vmatprep.subr.bf16.mxu1 %v5747_v15  ;;  %v5813_v15 = vld [vmem:[%s8345_s3 + $0xe64] ss:$16 sps:$4 sm:$0xff]  }
 0x1d6   :  { %4033 = vmatpush2.bf16.msra.mxu0 %v5742_v36  ;;  %v5808_v36 = vld [vmem:[%s8345_s3 + $0xc60] ss:$16 sps:$4 sm:$0xff]  }
 0x1d7   :  { %4074 = vmatpush2.bf16.msra.mxu1 %v5745_v37  ;;  %4034 = vmatprep.subr.bf16.mxu0 %v5750_v42  ;;  %v5811_v37 = vld [vmem:[%s8345_s3 + $0xe60] ss:$16 sps:$4 sm:$0xff]   ;;  %v5816_v42 = vld [vmem:[%s8345_s3 + $0xc44] ss:$16 sps:$4 sm:$0xff]  }
 0x1d8   :  { %4075 = vmatprep.subr.bf16.mxu1 %v5753_v20  ;;  %v5819_v20 = vld [vmem:[%s8345_s3 + $0xe44] ss:$16 sps:$4 sm:$0xff]  }
 0x1da   :  { %4035 = vmatpush2.bf16.msra.mxu0 %v5748_v43  ;;  %v5814_v43 = vld [vmem:[%s8345_s3 + $0xc40] ss:$16 sps:$4 sm:$0xff]  }
 0x1db   :  { %4076 = vmatpush2.bf16.msra.mxu1 %v5751_v47  ;;  %4036 = vmatprep.subr.bf16.mxu0 %v5756_v21  ;;  %v5817_v47 = vld [vmem:[%s8345_s3 + $0xe40] ss:$16 sps:$4 sm:$0xff]   ;;  %v5822_v21 = vld [vmem:[%s8345_s3 + $0xc24] ss:$16 sps:$4 sm:$0xff]  }
 0x1dc   :  { %4077 = vmatprep.subr.bf16.mxu1 %v5759_v44  ;;  %v5825_v44 = vld [vmem:[%s8345_s3 + $0xe24] ss:$16 sps:$4 sm:$0xff]  }
 0x1de   :  { %4037 = vmatpush2.bf16.msra.mxu0 %v5754_v48  ;;  %v5820_v48 = vld [vmem:[%s8345_s3 + $0xc20] ss:$16 sps:$4 sm:$0xff]  }
 0x1df   :  { %4078 = vmatpush2.bf16.msra.mxu1 %v5757_v51  ;;  %4038 = vmatprep.subr.bf16.mxu0 %v5762_v53  ;;  %v5823_v51 = vld [vmem:[%s8345_s3 + $0xe20] ss:$16 sps:$4 sm:$0xff]   ;;  %v5828_v53 = vld [vmem:[%s8345_s3 + $0xc04] ss:$16 sps:$4 sm:$0xff]  }
 0x1e0   :  { %4079 = vmatprep.subr.bf16.mxu1 %v5765_v40  ;;  %v5831_v40 = vld [vmem:[%s8345_s3 + $0xe04] ss:$16 sps:$4 sm:$0xff]  }
 0x1e2   :  { %4039 = vmatpush2.bf16.msra.mxu0 %v5760_v18  ;;  %v5826_v18 = vld [vmem:[%s8345_s3 + $0xc00] ss:$16 sps:$4 sm:$0xff]  }
 0x1e3   :  { %4080 = vmatpush2.bf16.msra.mxu1 %v5763_v54  ;;  %4040 = vmatprep.subr.bf16.mxu0 %v5768_v19  ;;  %v5829_v54 = vld [vmem:[%s8345_s3 + $0xe00] ss:$16 sps:$4 sm:$0xff]   ;;  %v5834_v19 = vld [vmem:[%s8345_s3 + $0xde4] ss:$16 sps:$4 sm:$0xff]  }
 0x1e4   :  { %4081 = vmatprep.subr.bf16.mxu1 %v5771_v57  ;;  %v5837_v57 = vld [vmem:[%s8345_s3 + $0xfe4] ss:$16 sps:$4 sm:$0xff]  }
 0x1e6   :  { %4041 = vmatpush2.bf16.msra.mxu0 %v5766_v58  ;;  %v5832_v58 = vld [vmem:[%s8345_s3 + $0xde0] ss:$16 sps:$4 sm:$0xff]  }
 0x1e7   :  { %4082 = vmatpush2.bf16.msra.mxu1 %v5769_v59  ;;  %4042 = vmatprep.subr.bf16.mxu0 %v5774_v61  ;;  %v5835_v59 = vld [vmem:[%s8345_s3 + $0xfe0] ss:$16 sps:$4 sm:$0xff]   ;;  %v5840_v61 = vld [vmem:[%s8345_s3 + $0xdc4] ss:$16 sps:$4 sm:$0xff]  }
 0x1e8   :  { %4083 = vmatprep.subr.bf16.mxu1 %v5777_v62  ;;  %v5843_v62 = vld [vmem:[%s8345_s3 + $0xfc4] ss:$16 sps:$4 sm:$0xff]  }
 0x1ea   :  { %4043 = vmatpush2.bf16.msra.mxu0 %v5772_v63  ;;  %v5838_v63 = vld [vmem:[%s8345_s3 + $0xdc0] ss:$16 sps:$4 sm:$0xff]  }
 0x1eb   :  { %4084 = vmatpush2.bf16.msra.mxu1 %v5775_v0  ;;  %4044 = vmatprep.subr.bf16.mxu0 %v5780_v1  ;;  %v5841_v0 = vld [vmem:[%s8345_s3 + $0xfc0] ss:$16 sps:$4 sm:$0xff]   ;;  %v5846_v1 = vld [vmem:[%s8345_s3 + $0xda4] ss:$16 sps:$4 sm:$0xff]  }
 0x1ec   :  { %4085 = vmatprep.subr.bf16.mxu1 %v5783_v4  ;;  %v5849_v4 = vld [vmem:[%s8345_s3 + $0xfa4] ss:$16 sps:$4 sm:$0xff]  }
 0x1ee   :  { %4045 = vmatpush2.bf16.msra.mxu0 %v5778_v6  ;;  %v5844_v6 = vld [vmem:[%s8345_s3 + $0xda0] ss:$16 sps:$4 sm:$0xff]  }
 0x1ef   :  { %4086 = vmatpush2.bf16.msra.mxu1 %v5781_v7  ;;  %4096 = vmatprep.subr.bf16.mxu0 %v5786_v10  ;;  %v5847_v7 = vld [vmem:[%s8345_s3 + $0xfa0] ss:$16 sps:$4 sm:$0xff]   ;;  %v5852_v10 = vld [vmem:[%s8345_s3 + $0xd84] ss:$16 sps:$4 sm:$0xff]  }
 0x1f0   :  { %4137 = vmatprep.subr.bf16.mxu1 %v5789_v11  ;;  %v5855_v11 = vld [vmem:[%s8345_s3 + $0xf84] ss:$16 sps:$4 sm:$0xff]  }
 0x1f1   :  { %4047 = vmatmul.mubr.bf16.vlgmr.msra.gmra.mxu0 %v7209_v13 }
 0x1f2   :  { %4088 = vmatmul.mubr.bf16.vlgmr.msra.gmra.mxu1 %v7216_v17  ;;  %4097 = vmatpush1.bf16.msra.mxu0 %v5784_v12  ;;  %v5850_v12 = vld [vmem:[%s8345_s3 + $0xd80] ss:$16 sps:$4 sm:$0xff]  }
 0x1f3   :  { %4128 = vmatprep.mubr.bf16.mxu0 %v7223_v23  ;;  %4138 = vmatpush1.bf16.msra.mxu1 %v5787_v16  ;;  %v5853_v16 = vld [vmem:[%s8345_s3 + $0xf80] ss:$16 sps:$4 sm:$0xff]  }
 0x1f4   :  { %4169 = vmatprep.mubr.bf16.mxu1 %v7231_v26  ;;  %4098 = vmatprep.subr.bf16.mxu0 %v5792_v22  ;;  %v5858_v22 = vld [vmem:[%s8345_s3 + $0xd64] ss:$16 sps:$4 sm:$0xff]  }
 0x1f5   :  { %4139 = vmatprep.subr.bf16.mxu1 %v5795_v8  ;;  %v5861_v8 = vld [vmem:[%s8345_s3 + $0xf64] ss:$16 sps:$4 sm:$0xff]  }
 0x1f6   :  { %4099 = vmatpush1.bf16.msra.mxu0 %v5790_v9  ;;  %v5856_v9 = vld [vmem:[%s8345_s3 + $0xd60] ss:$16 sps:$4 sm:$0xff]  }
 0x1f7   :  { %4140 = vmatpush1.bf16.msra.mxu1 %v5793_v45  ;;  %4100 = vmatprep.subr.bf16.mxu0 %v5798_v27  ;;  %v5859_v45 = vld [vmem:[%s8345_s3 + $0xf60] ss:$16 sps:$4 sm:$0xff]   ;;  %v5864_v27 = vld [vmem:[%s8345_s3 + $0xd44] ss:$16 sps:$4 sm:$0xff]  }
 0x1f8   :  { %4141 = vmatprep.subr.bf16.mxu1 %v5801_v46  ;;  %v5867_v46 = vld [vmem:[%s8345_s3 + $0xf44] ss:$16 sps:$4 sm:$0xff]  }
 0x1fa   :  { %4101 = vmatpush1.bf16.msra.mxu0 %v5796_v28  ;;  %v5862_v28 = vld [vmem:[%s8345_s3 + $0xd40] ss:$16 sps:$4 sm:$0xff]  }
 0x1fb   :  { %4142 = vmatpush1.bf16.msra.mxu1 %v5799_v29  ;;  %4102 = vmatprep.subr.bf16.mxu0 %v5804_v32  ;;  %v5865_v29 = vld [vmem:[%s8345_s3 + $0xf40] ss:$16 sps:$4 sm:$0xff]   ;;  %v5870_v32 = vld [vmem:[%s8345_s3 + $0xd24] ss:$16 sps:$4 sm:$0xff]  }
 0x1fc   :  { %4143 = vmatprep.subr.bf16.mxu1 %v5807_v33  ;;  %v5873_v33 = vld [vmem:[%s8345_s3 + $0xf24] ss:$16 sps:$4 sm:$0xff]  }
 0x1fe   :  { %4103 = vmatpush1.bf16.msra.mxu0 %v5802_v34  ;;  %v5868_v34 = vld [vmem:[%s8345_s3 + $0xd20] ss:$16 sps:$4 sm:$0xff]  }
 0x1ff   :  { %4144 = vmatpush1.bf16.msra.mxu1 %v5805_v35  ;;  %4104 = vmatprep.subr.bf16.mxu0 %v5810_v14  ;;  %v5871_v35 = vld [vmem:[%s8345_s3 + $0xf20] ss:$16 sps:$4 sm:$0xff]   ;;  %v5876_v14 = vld [vmem:[%s8345_s3 + $0xd04] ss:$16 sps:$4 sm:$0xff]  }
 0x200   :  { %4145 = vmatprep.subr.bf16.mxu1 %v5813_v15  ;;  %v5879_v15 = vld [vmem:[%s8345_s3 + $0xf04] ss:$16 sps:$4 sm:$0xff]  }
 0x202   :  { %4105 = vmatpush1.bf16.msra.mxu0 %v5808_v36  ;;  %v5874_v36 = vld [vmem:[%s8345_s3 + $0xd00] ss:$16 sps:$4 sm:$0xff]  }
 0x203   :  { %4146 = vmatpush1.bf16.msra.mxu1 %v5811_v37  ;;  %4106 = vmatprep.subr.bf16.mxu0 %v5816_v42  ;;  %v5877_v37 = vld [vmem:[%s8345_s3 + $0xf00] ss:$16 sps:$4 sm:$0xff]   ;;  %v5882_v42 = vld [vmem:[%s8345_s3 + $0xec] ss:$16 sps:$4 sm:$0xff]  }
 0x204   :  { %4147 = vmatprep.subr.bf16.mxu1 %v5819_v20  ;;  %v1268_v20 = vld [vmem:[%s8348_s4] sm:$0xf] }
 0x206   :  { %4107 = vmatpush1.bf16.msra.mxu0 %v5814_v43  ;;  %v5885_v43 = vld [vmem:[%s8345_s3 + $0x2ec] ss:$16 sps:$4 sm:$0xff]  }
 0x207   :  { %4148 = vmatpush1.bf16.msra.mxu1 %v5817_v47  ;;  %4108 = vmatprep.subr.bf16.mxu0 %v5822_v21  ;;  %v5880_v47 = vld [vmem:[%s8345_s3 + $0xe8] ss:$16 sps:$4 sm:$0xff]   ;;  %v1273_v21 = vrot.slane %v1268_v20, %v6649_v2  ;;  %v5888_v2 = vld [vmem:[%s8345_s3 + $0xcc] ss:$16 sps:$4 sm:$0xff]  }
 0x208   :  { %4149 = vmatprep.subr.bf16.mxu1 %v5825_v44  ;;  %v7425_v44 = vpack.c.bf16 %v6836_v38, %v6836_v38 }
 0x20a   :  { %4109 = vmatpush1.bf16.msra.mxu0 %v5820_v48  ;;  %v5883_v48 = vld [vmem:[%s8345_s3 + $0x2e8] ss:$16 sps:$4 sm:$0xff]  }
 0x20b   :  { %4150 = vmatpush1.bf16.msra.mxu1 %v5823_v51  ;;  %4110 = vmatprep.subr.bf16.mxu0 %v5828_v53  ;;  %v7432_v51 = vpack.c.bf16 %v6838_v39, %v6838_v39  ;;  %v1277_v53 = vrot.slane %v1268_v20, %v6658_v60  ;;  %v5886_v60 = vld [vmem:[%s8345_s3 + $0xc8] ss:$16 sps:$4 sm:$0xff]  }
 0x20c   :  { %4151 = vmatprep.subr.bf16.mxu1 %v5831_v40  ;;  %v5928_v20 = vld [vmem:[%s8345_s3 + $0x1e8] ss:$16 sps:$4 sm:$0xff]  }
 0x20e   :  { %4111 = vmatpush1.bf16.msra.mxu0 %v5826_v18  ;;  %v5891_v18 = vld [vmem:[%s8345_s3 + $0x2cc] ss:$16 sps:$4 sm:$0xff]  }
 0x20f   :  { %4152 = vmatpush1.bf16.msra.mxu1 %v5829_v54  ;;  %4112 = vmatprep.subr.bf16.mxu0 %v5834_v19 }
 0x210   :  { %4153 = vmatprep.subr.bf16.mxu1 %v5837_v57  ;;  %v5889_v57 = vld [vmem:[%s8345_s3 + $0x2c8] ss:$16 sps:$4 sm:$0xff]  }
 0x212   :  { %4113 = vmatpush2.bf16.msra.mxu0 %v5832_v58  ;;  %v5894_v58 = vld [vmem:[%s8345_s3 + $0xac] ss:$16 sps:$4 sm:$0xff]  }
 0x213   :  { %4154 = vmatpush2.bf16.msra.mxu1 %v5835_v59  ;;  %4114 = vmatprep.subr.bf16.mxu0 %v5840_v61 }
 0x214   :  { %4155 = vmatprep.subr.bf16.mxu1 %v5843_v62 }
 0x216   :  { %4115 = vmatpush2.bf16.msra.mxu0 %v5838_v63 }
 0x217   :  { %4156 = vmatpush2.bf16.msra.mxu1 %v5841_v0  ;;  %4116 = vmatprep.subr.bf16.mxu0 %v5846_v1  ;;  %v5892_v1 = vld [vmem:[%s8345_s3 + $0xa8] ss:$16 sps:$4 sm:$0xff]  }
 0x218   :  { %4157 = vmatprep.subr.bf16.mxu1 %v5849_v4 }
 0x21a   :  { %4117 = vmatpush2.bf16.msra.mxu0 %v5844_v6 }
 0x21b   :  { %4158 = vmatpush2.bf16.msra.mxu1 %v5847_v7  ;;  %4118 = vmatprep.subr.bf16.mxu0 %v5852_v10  ;;  %v5900_v7 = vld [vmem:[%s8345_s3 + $0x8c] ss:$16 sps:$4 sm:$0xff]  }
 0x21c   :  { %4159 = vmatprep.subr.bf16.mxu1 %v5855_v11  ;;  %v5903_v10 = vld [vmem:[%s8345_s3 + $0x28c] ss:$16 sps:$4 sm:$0xff]   ;;  %v5898_v11 = vld [vmem:[%s8345_s3 + $0x88] ss:$16 sps:$4 sm:$0xff]  }
 0x21e   :  { %4119 = vmatpush2.bf16.msra.mxu0 %v5850_v12  ;;  %v5901_v12 = vld [vmem:[%s8345_s3 + $0x288] ss:$16 sps:$4 sm:$0xff]  }
 0x21f   :  { %4160 = vmatpush2.bf16.msra.mxu1 %v5853_v16  ;;  %4120 = vmatprep.subr.bf16.mxu0 %v5858_v22  ;;  %v5906_v16 = vld [vmem:[%s8345_s3 + $0x6c] ss:$16 sps:$4 sm:$0xff]  }
 0x220   :  { %4161 = vmatprep.subr.bf16.mxu1 %v5861_v8  ;;  %v5909_v22 = vld [vmem:[%s8345_s3 + $0x26c] ss:$16 sps:$4 sm:$0xff]   ;;  %v5904_v8 = vld [vmem:[%s8345_s3 + $0x68] ss:$16 sps:$4 sm:$0xff]  }
 0x222   :  { %4121 = vmatpush2.bf16.msra.mxu0 %v5856_v9  ;;  %v5907_v9 = vld [vmem:[%s8345_s3 + $0x268] ss:$16 sps:$4 sm:$0xff]  }
 0x223   :  { %4162 = vmatpush2.bf16.msra.mxu1 %v5859_v45  ;;  %4122 = vmatprep.subr.bf16.mxu0 %v5864_v27  ;;  %v5912_v45 = vld [vmem:[%s8345_s3 + $0x4c] ss:$16 sps:$4 sm:$0xff]  }
 0x224   :  { %4163 = vmatprep.subr.bf16.mxu1 %v5867_v46  ;;  %v5915_v27 = vld [vmem:[%s8345_s3 + $0x24c] ss:$16 sps:$4 sm:$0xff]   ;;  %v5910_v46 = vld [vmem:[%s8345_s3 + $0x48] ss:$16 sps:$4 sm:$0xff]  }
 0x226   :  { %4123 = vmatpush2.bf16.msra.mxu0 %v5862_v28  ;;  %v5913_v28 = vld [vmem:[%s8345_s3 + $0x248] ss:$16 sps:$4 sm:$0xff]  }
 0x227   :  { %4164 = vmatpush2.bf16.msra.mxu1 %v5865_v29  ;;  %4124 = vmatprep.subr.bf16.mxu0 %v5870_v32  ;;  %v5918_v29 = vld [vmem:[%s8345_s3 + $0x2c] ss:$16 sps:$4 sm:$0xff]  }
 0x228   :  { %4165 = vmatprep.subr.bf16.mxu1 %v5873_v33  ;;  %v5921_v32 = vld [vmem:[%s8345_s3 + $0x22c] ss:$16 sps:$4 sm:$0xff]   ;;  %v5916_v33 = vld [vmem:[%s8345_s3 + $0x28] ss:$16 sps:$4 sm:$0xff]  }
 0x22a   :  { %4125 = vmatpush2.bf16.msra.mxu0 %v5868_v34  ;;  %v5919_v34 = vld [vmem:[%s8345_s3 + $0x228] ss:$16 sps:$4 sm:$0xff]  }
 0x22b   :  { %4166 = vmatpush2.bf16.msra.mxu1 %v5871_v35  ;;  %4126 = vmatprep.subr.bf16.mxu0 %v5876_v14  ;;  %v5924_v35 = vld [vmem:[%s8345_s3 + $0xc] ss:$16 sps:$4 sm:$0xff]  }
 0x22c   :  { %4167 = vmatprep.subr.bf16.mxu1 %v5879_v15  ;;  %v5927_v14 = vld [vmem:[%s8345_s3 + $0x20c] ss:$16 sps:$4 sm:$0xff]   ;;  %v5922_v15 = vld [vmem:[%s8345_s3 + $0x8] ss:$16 sps:$4 sm:$0xff]  }
 0x22e   :  { %4127 = vmatpush2.bf16.msra.mxu0 %v5874_v36  ;;  %v5925_v36 = vld [vmem:[%s8345_s3 + $0x208] ss:$16 sps:$4 sm:$0xff]  }
 0x22f   :  { %4168 = vmatpush2.bf16.msra.mxu1 %v5877_v37  ;;  %4178 = vmatprep.subr.bf16.mxu0 %v5882_v42  ;;  %v5930_v37 = vld [vmem:[%s8345_s3 + $0x1ec] ss:$16 sps:$4 sm:$0xff]  }
 0x230   :  { %4219 = vmatprep.subr.bf16.mxu1 %v5885_v43  ;;  %v5933_v42 = vld [vmem:[%s8345_s3 + $0x3ec] ss:$16 sps:$4 sm:$0xff]   ;;  %v5931_v43 = vld [vmem:[%s8345_s3 + $0x3e8] ss:$16 sps:$4 sm:$0xff]  }
 0x231   :  { %4129 = vmatmul.mubr.bf16.vlgmr.msra.gmra.mxu0 %v7425_v44  ;;  %v3884_v38 = vpop.f32.mrf.mxu0  ;;  %v3925_v40 = vpop.f32.mrf.mxu1 }
 0x232   :  { %4170 = vmatmul.mubr.bf16.vlgmr.msra.gmra.mxu1 %v7432_v51  ;;  %v3885_v54 = vadd.f32 %v3884_v38, %v1273_v21  ;;  %4179 = vmatpush1.bf16.msra.mxu0 %v5880_v47  ;;  %v5936_v47 = vld [vmem:[%s8345_s3 + $0x1cc] ss:$16 sps:$4 sm:$0xff]  }
 0x233   :  { %4210 = vmatprep.mubr.bf16.mxu0 %v6680_v24  ;;  %4220 = vmatpush1.bf16.msra.mxu1 %v5883_v48  ;;  %v3886_v39 = vpop.f32.mrf.mxu0  ;;  %v3927_v19 = vpop.f32.mrf.mxu1  ;;  %v5897_v24 = vld [vmem:[%s8345_s3 + $0x2ac] ss:$16 sps:$4 sm:$0xff]   ;;  %v5934_v48 = vld [vmem:[%s8345_s3 + $0x1c8] ss:$16 sps:$4 sm:$0xff]  }
 0x234   :  { %v7453_v59 = vadd.f32 %v3925_v40, %v3885_v54  ;;  %4251 = vmatprep.mubr.bf16.mxu1 %v6685_v25  ;;  %v3887_v61 = vadd.f32 %v3886_v39, %v1277_v53  ;;  %4180 = vmatprep.subr.bf16.mxu0 %v5888_v2  ;;  %v5895_v25 = vld [vmem:[%s8345_s3 + $0x2a8] ss:$16 sps:$4 sm:$0xff]   ;;  %v5939_v21 = vld [vmem:[%s8345_s3 + $0x3cc] ss:$16 sps:$4 sm:$0xff]  }
 0x235   :  { %4221 = vmatprep.subr.bf16.mxu1 %v5891_v18  ;;  %v3888_v62 = vpop.f32.mrf.mxu0  ;;  %v3929_v63 = vpop.f32.mrf.mxu1  ;;  %v5937_v53 = vld [vmem:[%s8345_s3 + $0x3c8] ss:$16 sps:$4 sm:$0xff]   ;;  %v5942_v2 = vld [vmem:[%s8345_s3 + $0x1ac] ss:$16 sps:$4 sm:$0xff]  }
 0x236   :  { %v7459_v0 = vadd.f32 %v3927_v19, %v3887_v61  ;;  %4181 = vmatpush1.bf16.msra.mxu0 %v5886_v60  ;;  %v5945_v38 = vld [vmem:[%s8345_s3 + $0x3ac] ss:$16 sps:$4 sm:$0xff]   ;;  %v5940_v40 = vld [vmem:[%s8345_s3 + $0x1a8] ss:$16 sps:$4 sm:$0xff]  }
 0x237   :  { %4222 = vmatpush1.bf16.msra.mxu1 %v5889_v57  ;;  %v3889_v4 = vpop.f32.mrf.mxu0  ;;  %v3930_v6 = vpop.f32.mrf.mxu1  ;;  %4182 = vmatprep.subr.bf16.mxu0 %v5894_v58  ;;  %v5943_v18 = vld [vmem:[%s8345_s3 + $0x3a8] ss:$16 sps:$4 sm:$0xff]   ;;  %v5948_v54 = vld [vmem:[%s8345_s3 + $0x18c] ss:$16 sps:$4 sm:$0xff]  }
 0x238   :  { %4223 = vmatprep.subr.bf16.mxu1 %v5897_v24  ;;  %v5951_v60 = vld [vmem:[%s8345_s3 + $0x38c] ss:$16 sps:$4 sm:$0xff]   ;;  %v5946_v39 = vld [vmem:[%s8345_s3 + $0x188] ss:$16 sps:$4 sm:$0xff]  }
 0x239   :  { %v5949_v19 = vld [vmem:[%s8345_s3 + $0x388] ss:$16 sps:$4 sm:$0xff]   ;;  %v5954_v57 = vld [vmem:[%s8345_s3 + $0x16c] ss:$16 sps:$4 sm:$0xff]  }
 0x23a   :  { %4183 = vmatpush1.bf16.msra.mxu0 %v5892_v1  ;;  %v5957_v58 = vld [vmem:[%s8345_s3 + $0x36c] ss:$16 sps:$4 sm:$0xff]   ;;  %v5952_v61 = vld [vmem:[%s8345_s3 + $0x168] ss:$16 sps:$4 sm:$0xff]  }
 0x23b   :  { %4224 = vmatpush1.bf16.msra.mxu1 %v5895_v25  ;;  %4184 = vmatprep.subr.bf16.mxu0 %v5900_v7  ;;  %v5955_v24 = vld [vmem:[%s8345_s3 + $0x368] ss:$16 sps:$4 sm:$0xff]   ;;  %v5960_v62 = vld [vmem:[%s8345_s3 + $0x14c] ss:$16 sps:$4 sm:$0xff]  }
 0x23c   :  { %4225 = vmatprep.subr.bf16.mxu1 %v5903_v10  ;;  %v5963_v63 = vld [vmem:[%s8345_s3 + $0x34c] ss:$16 sps:$4 sm:$0xff]   ;;  %v5958_v1 = vld [vmem:[%s8345_s3 + $0x148] ss:$16 sps:$4 sm:$0xff]  }
 0x23d   :  { %v5961_v4 = vld [vmem:[%s8345_s3 + $0x348] ss:$16 sps:$4 sm:$0xff]   ;;  %v5966_v6 = vld [vmem:[%s8345_s3 + $0x12c] ss:$16 sps:$4 sm:$0xff]  }
 0x23e   :  { %4185 = vmatpush1.bf16.msra.mxu0 %v5898_v11  ;;  %v5969_v25 = vld [vmem:[%s8345_s3 + $0x32c] ss:$16 sps:$4 sm:$0xff]   ;;  %v5964_v7 = vld [vmem:[%s8345_s3 + $0x128] ss:$16 sps:$4 sm:$0xff]  }
 0x23f   :  { %4226 = vmatpush1.bf16.msra.mxu1 %v5901_v12  ;;  %4186 = vmatprep.subr.bf16.mxu0 %v5906_v16  ;;  %v5967_v10 = vld [vmem:[%s8345_s3 + $0x328] ss:$16 sps:$4 sm:$0xff]   ;;  %v5972_v11 = vld [vmem:[%s8345_s3 + $0x10c] ss:$16 sps:$4 sm:$0xff]  }
 0x240   :  { %4227 = vmatprep.subr.bf16.mxu1 %v5909_v22  ;;  %v5975_v12 = vld [vmem:[%s8345_s3 + $0x30c] ss:$16 sps:$4 sm:$0xff]   ;;  %v5970_v16 = vld [vmem:[%s8345_s3 + $0x108] ss:$16 sps:$4 sm:$0xff]  }
 0x241   :  { %v5973_v22 = vld [vmem:[%s8345_s3 + $0x308] ss:$16 sps:$4 sm:$0xff]  }
 0x242   :  { %4187 = vmatpush1.bf16.msra.mxu0 %v5904_v8  ;;  %v5978_v8 = vld [vmem:[%s8345_s3 + $0x4ec] ss:$16 sps:$4 sm:$0xff]  }
 0x243   :  { %4228 = vmatpush1.bf16.msra.mxu1 %v5907_v9  ;;  %4188 = vmatprep.subr.bf16.mxu0 %v5912_v45  ;;  %v5981_v9 = vld [vmem:[%s8345_s3 + $0x6ec] ss:$16 sps:$4 sm:$0xff]   ;;  %v5976_v45 = vld [vmem:[%s8345_s3 + $0x4e8] ss:$16 sps:$4 sm:$0xff]  }
 0x244   :  { %4229 = vmatprep.subr.bf16.mxu1 %v5915_v27  ;;  %v5979_v27 = vld [vmem:[%s8345_s3 + $0x6e8] ss:$16 sps:$4 sm:$0xff]  }
 0x246   :  { %4189 = vmatpush1.bf16.msra.mxu0 %v5910_v46  ;;  %v5984_v46 = vld [vmem:[%s8345_s3 + $0x4cc] ss:$16 sps:$4 sm:$0xff]  }
 0x247   :  { %4230 = vmatpush1.bf16.msra.mxu1 %v5913_v28  ;;  %4190 = vmatprep.subr.bf16.mxu0 %v5918_v29 }
 0x248   :  { %4231 = vmatprep.subr.bf16.mxu1 %v5921_v32  ;;  %v5987_v32 = vld [vmem:[%s8345_s3 + $0x6cc] ss:$16 sps:$4 sm:$0xff]  }
 0x24a   :  { %4191 = vmatpush1.bf16.msra.mxu0 %v5916_v33 }
 0x24b   :  { %4232 = vmatpush1.bf16.msra.mxu1 %v5919_v34  ;;  %4192 = vmatprep.subr.bf16.mxu0 %v5924_v35  ;;  %v5982_v34 = vld [vmem:[%s8345_s3 + $0x4c8] ss:$16 sps:$4 sm:$0xff]  }
 0x24c   :  { %4233 = vmatprep.subr.bf16.mxu1 %v5927_v14 }
 0x24e   :  { %4193 = vmatpush1.bf16.msra.mxu0 %v5922_v15 }
 0x24f   :  { %4234 = vmatpush1.bf16.msra.mxu1 %v5925_v36  ;;  %4194 = vmatprep.subr.bf16.mxu0 %v5930_v37 }
 0x250   :  { %4235 = vmatprep.subr.bf16.mxu1 %v5933_v42 }
 0x252   :  { %4195 = vmatpush2.bf16.msra.mxu0 %v5928_v20  ;;  %v5988_v20 = vld [vmem:[%s8345_s3 + $0x4a8] ss:$16 sps:$4 sm:$0xff]  }
 0x253   :  { %4236 = vmatpush2.bf16.msra.mxu1 %v5931_v43  ;;  %4196 = vmatprep.subr.bf16.mxu0 %v5936_v47  ;;  %v5996_v47 = vld [vmem:[%s8345_s3 + $0x48c] ss:$16 sps:$4 sm:$0xff]  }
 0x254   :  { %4237 = vmatprep.subr.bf16.mxu1 %v5939_v21  ;;  %v5999_v21 = vld [vmem:[%s8345_s3 + $0x68c] ss:$16 sps:$4 sm:$0xff]  }
 0x256   :  { %4197 = vmatpush2.bf16.msra.mxu0 %v5934_v48  ;;  %v5994_v48 = vld [vmem:[%s8345_s3 + $0x488] ss:$16 sps:$4 sm:$0xff]  }
 0x257   :  { %4238 = vmatpush2.bf16.msra.mxu1 %v5937_v53  ;;  %4198 = vmatprep.subr.bf16.mxu0 %v5942_v2  ;;  %v5997_v53 = vld [vmem:[%s8345_s3 + $0x688] ss:$16 sps:$4 sm:$0xff]   ;;  %v6002_v2 = vld [vmem:[%s8345_s3 + $0x46c] ss:$16 sps:$4 sm:$0xff]  }
 0x258   :  { %4239 = vmatprep.subr.bf16.mxu1 %v5945_v38  ;;  %v6005_v38 = vld [vmem:[%s8345_s3 + $0x66c] ss:$16 sps:$4 sm:$0xff]  }
 0x25a   :  { %4199 = vmatpush2.bf16.msra.mxu0 %v5940_v40  ;;  %v6000_v40 = vld [vmem:[%s8345_s3 + $0x468] ss:$16 sps:$4 sm:$0xff]  }
 0x25b   :  { %4240 = vmatpush2.bf16.msra.mxu1 %v5943_v18  ;;  %4200 = vmatprep.subr.bf16.mxu0 %v5948_v54  ;;  %v6003_v18 = vld [vmem:[%s8345_s3 + $0x668] ss:$16 sps:$4 sm:$0xff]   ;;  %v6008_v54 = vld [vmem:[%s8345_s3 + $0x44c] ss:$16 sps:$4 sm:$0xff]  }
 0x25c   :  { %4241 = vmatprep.subr.bf16.mxu1 %v5951_v60  ;;  %v6011_v60 = vld [vmem:[%s8345_s3 + $0x64c] ss:$16 sps:$4 sm:$0xff]  }
 0x25e   :  { %4201 = vmatpush2.bf16.msra.mxu0 %v5946_v39  ;;  %v6006_v39 = vld [vmem:[%s8345_s3 + $0x448] ss:$16 sps:$4 sm:$0xff]  }
 0x25f   :  { %4242 = vmatpush2.bf16.msra.mxu1 %v5949_v19  ;;  %4202 = vmatprep.subr.bf16.mxu0 %v5954_v57  ;;  %v6009_v19 = vld [vmem:[%s8345_s3 + $0x648] ss:$16 sps:$4 sm:$0xff]   ;;  %v6014_v57 = vld [vmem:[%s8345_s3 + $0x42c] ss:$16 sps:$4 sm:$0xff]  }
 0x260   :  { %4243 = vmatprep.subr.bf16.mxu1 %v5957_v58  ;;  %v6017_v58 = vld [vmem:[%s8345_s3 + $0x62c] ss:$16 sps:$4 sm:$0xff]  }
 0x262   :  { %4203 = vmatpush2.bf16.msra.mxu0 %v5952_v61  ;;  %v6012_v61 = vld [vmem:[%s8345_s3 + $0x428] ss:$16 sps:$4 sm:$0xff]  }
 0x263   :  { %4244 = vmatpush2.bf16.msra.mxu1 %v5955_v24  ;;  %4204 = vmatprep.subr.bf16.mxu0 %v5960_v62  ;;  %v6015_v24 = vld [vmem:[%s8345_s3 + $0x628] ss:$16 sps:$4 sm:$0xff]   ;;  %v6020_v62 = vld [vmem:[%s8345_s3 + $0x40c] ss:$16 sps:$4 sm:$0xff]  }
 0x264   :  { %4245 = vmatprep.subr.bf16.mxu1 %v5963_v63  ;;  %v6023_v63 = vld [vmem:[%s8345_s3 + $0x60c] ss:$16 sps:$4 sm:$0xff]  }
 0x266   :  { %4205 = vmatpush2.bf16.msra.mxu0 %v5958_v1  ;;  %v6018_v1 = vld [vmem:[%s8345_s3 + $0x408] ss:$16 sps:$4 sm:$0xff]  }
 0x267   :  { %4246 = vmatpush2.bf16.msra.mxu1 %v5961_v4  ;;  %4206 = vmatprep.subr.bf16.mxu0 %v5966_v6  ;;  %v6021_v4 = vld [vmem:[%s8345_s3 + $0x608] ss:$16 sps:$4 sm:$0xff]   ;;  %v6026_v6 = vld [vmem:[%s8345_s3 + $0x5ec] ss:$16 sps:$4 sm:$0xff]  }
 0x268   :  { %4247 = vmatprep.subr.bf16.mxu1 %v5969_v25  ;;  %v6029_v25 = vld [vmem:[%s8345_s3 + $0x7ec] ss:$16 sps:$4 sm:$0xff]  }
 0x26a   :  { %4207 = vmatpush2.bf16.msra.mxu0 %v5964_v7  ;;  %v6024_v7 = vld [vmem:[%s8345_s3 + $0x5e8] ss:$16 sps:$4 sm:$0xff]  }
 0x26b   :  { %4248 = vmatpush2.bf16.msra.mxu1 %v5967_v10  ;;  %4208 = vmatprep.subr.bf16.mxu0 %v5972_v11  ;;  %v6027_v10 = vld [vmem:[%s8345_s3 + $0x7e8] ss:$16 sps:$4 sm:$0xff]   ;;  %v6032_v11 = vld [vmem:[%s8345_s3 + $0x5cc] ss:$16 sps:$4 sm:$0xff]  }
 0x26c   :  { %4249 = vmatprep.subr.bf16.mxu1 %v5975_v12  ;;  %v6035_v12 = vld [vmem:[%s8345_s3 + $0x7cc] ss:$16 sps:$4 sm:$0xff]  }
 0x26e   :  { %4209 = vmatpush2.bf16.msra.mxu0 %v5970_v16  ;;  %v6030_v16 = vld [vmem:[%s8345_s3 + $0x5c8] ss:$16 sps:$4 sm:$0xff]  }
 0x26f   :  { %4250 = vmatpush2.bf16.msra.mxu1 %v5973_v22  ;;  %4260 = vmatprep.subr.bf16.mxu0 %v5978_v8  ;;  %v6033_v22 = vld [vmem:[%s8345_s3 + $0x7c8] ss:$16 sps:$4 sm:$0xff]   ;;  %v6038_v8 = vld [vmem:[%s8345_s3 + $0x5ac] ss:$16 sps:$4 sm:$0xff]  }
 0x270   :  { %4301 = vmatprep.subr.bf16.mxu1 %v5981_v9  ;;  %v6041_v9 = vld [vmem:[%s8345_s3 + $0x7ac] ss:$16 sps:$4 sm:$0xff]  }
 0x271   :  { %v3966_v28 = vpop.f32.mrf.mxu0  ;;  %v4007_v29 = vpop.f32.mrf.mxu1  ;;  %4211 = vmatmul.mubr.bf16.vlgmr.msra.gmra.mxu0 %v6697_v30  ;;  %v5985_v30 = vld [vmem:[%s8345_s3 + $0x6c8] ss:$16 sps:$4 sm:$0xff]  }
 0x272   :  { %v3967_v33 = vadd.f32 %v3966_v28, %v7453_v59  ;;  %4252 = vmatmul.mubr.bf16.vlgmr.msra.gmra.mxu1 %v6699_v31  ;;  %4261 = vmatpush1.bf16.msra.mxu0 %v5976_v45  ;;  %v5990_v59 = vld [vmem:[%s8345_s3 + $0x4ac] ss:$16 sps:$4 sm:$0xff]   ;;  %v6036_v45 = vld [vmem:[%s8345_s3 + $0x5a8] ss:$16 sps:$4 sm:$0xff]  }
 0x273   :  { %4292 = vmatprep.mubr.bf16.mxu0 %v6749_v55  ;;  %4302 = vmatpush1.bf16.msra.mxu1 %v5979_v27  ;;  %v3968_v35 = vpop.f32.mrf.mxu0  ;;  %v4009_v14 = vpop.f32.mrf.mxu1  ;;  %v5993_v55 = vld [vmem:[%s8345_s3 + $0x6ac] ss:$16 sps:$4 sm:$0xff]   ;;  %v6039_v27 = vld [vmem:[%s8345_s3 + $0x7a8] ss:$16 sps:$4 sm:$0xff]  }
 0x274   :  { %v7654_v15 = vadd.f32 %v4007_v29, %v3967_v33  ;;  %4333 = vmatprep.mubr.bf16.mxu1 %v6754_v56  ;;  %v3969_v31 = vadd.f32 %v3968_v35, %v7459_v0  ;;  %4262 = vmatprep.subr.bf16.mxu0 %v5984_v46  ;;  %v5991_v0 = vld [vmem:[%s8345_s3 + $0x6a8] ss:$16 sps:$4 sm:$0xff]   ;;  %v6044_v46 = vld [vmem:[%s8345_s3 + $0x58c] ss:$16 sps:$4 sm:$0xff]  }
 0x275   :  { %v3970_v36 = vpop.f32.mrf.mxu0  ;;  %v4011_v37 = vpop.f32.mrf.mxu1  ;;  %4303 = vmatprep.subr.bf16.mxu1 %v5987_v32  ;;  %v6047_v28 = vld [vmem:[%s8345_s3 + $0x78c] ss:$16 sps:$4 sm:$0xff]   ;;  %v6042_v29 = vld [vmem:[%s8345_s3 + $0x588] ss:$16 sps:$4 sm:$0xff]  }
 0x276   :  { %v7661_v42 = vadd.f32 %v4009_v14, %v3969_v31  ;;  %4263 = vmatpush1.bf16.msra.mxu0 %v5982_v34  ;;  %v6045_v32 = vld [vmem:[%s8345_s3 + $0x788] ss:$16 sps:$4 sm:$0xff]   ;;  %v6050_v33 = vld [vmem:[%s8345_s3 + $0x56c] ss:$16 sps:$4 sm:$0xff]  }
 0x277   :  { %4304 = vmatpush1.bf16.msra.mxu1 %v5985_v30  ;;  %v3971_v43 = vpop.f32.mrf.mxu0  ;;  %v4012_v56 = vpop.f32.mrf.mxu1  ;;  %4264 = vmatprep.subr.bf16.mxu0 %v5990_v59  ;;  %v6053_v34 = vld [vmem:[%s8345_s3 + $0x76c] ss:$16 sps:$4 sm:$0xff]   ;;  %v6048_v35 = vld [vmem:[%s8345_s3 + $0x568] ss:$16 sps:$4 sm:$0xff]  }
 0x278   :  { %4305 = vmatprep.subr.bf16.mxu1 %v5993_v55  ;;  %v6051_v14 = vld [vmem:[%s8345_s3 + $0x768] ss:$16 sps:$4 sm:$0xff]   ;;  %v6056_v30 = vld [vmem:[%s8345_s3 + $0x54c] ss:$16 sps:$4 sm:$0xff]  }
 0x279   :  { %v6059_v59 = vld [vmem:[%s8345_s3 + $0x74c] ss:$16 sps:$4 sm:$0xff]   ;;  %v6054_v31 = vld [vmem:[%s8345_s3 + $0x548] ss:$16 sps:$4 sm:$0xff]  }
 0x27a   :  { %4265 = vmatpush1.bf16.msra.mxu0 %v5988_v20  ;;  %v6057_v55 = vld [vmem:[%s8345_s3 + $0x748] ss:$16 sps:$4 sm:$0xff]   ;;  %v6062_v36 = vld [vmem:[%s8345_s3 + $0x52c] ss:$16 sps:$4 sm:$0xff]  }
 0x27b   :  { %4306 = vmatpush1.bf16.msra.mxu1 %v5991_v0  ;;  %4266 = vmatprep.subr.bf16.mxu0 %v5996_v47  ;;  %v6065_v37 = vld [vmem:[%s8345_s3 + $0x72c] ss:$16 sps:$4 sm:$0xff]   ;;  %v6060_v20 = vld [vmem:[%s8345_s3 + $0x528] ss:$16 sps:$4 sm:$0xff]  }
 0x27c   :  { %4307 = vmatprep.subr.bf16.mxu1 %v5999_v21  ;;  %v6063_v43 = vld [vmem:[%s8345_s3 + $0x728] ss:$16 sps:$4 sm:$0xff]   ;;  %v6068_v56 = vld [vmem:[%s8345_s3 + $0x50c] ss:$16 sps:$4 sm:$0xff]  }
 0x27d   :  { %v6071_v0 = vld [vmem:[%s8345_s3 + $0x70c] ss:$16 sps:$4 sm:$0xff]   ;;  %v6066_v47 = vld [vmem:[%s8345_s3 + $0x508] ss:$16 sps:$4 sm:$0xff]  }
 0x27e   :  { %4267 = vmatpush1.bf16.msra.mxu0 %v5994_v48  ;;  %v6069_v21 = vld [vmem:[%s8345_s3 + $0x708] ss:$16 sps:$4 sm:$0xff]   ;;  %v6074_v48 = vld [vmem:[%s8345_s3 + $0x8ec] ss:$16 sps:$4 sm:$0xff]  }
 0x27f   :  { %4308 = vmatpush1.bf16.msra.mxu1 %v5997_v53  ;;  %4268 = vmatprep.subr.bf16.mxu0 %v6002_v2  ;;  %v6077_v53 = vld [vmem:[%s8345_s3 + $0xaec] ss:$16 sps:$4 sm:$0xff]   ;;  %v6072_v2 = vld [vmem:[%s8345_s3 + $0x8e8] ss:$16 sps:$4 sm:$0xff]  }
 0x280   :  { %4309 = vmatprep.subr.bf16.mxu1 %v6005_v38  ;;  %v6075_v38 = vld [vmem:[%s8345_s3 + $0xae8] ss:$16 sps:$4 sm:$0xff]  }
 0x282   :  { %4269 = vmatpush1.bf16.msra.mxu0 %v6000_v40  ;;  %v6078_v40 = vld [vmem:[%s8345_s3 + $0x8c8] ss:$16 sps:$4 sm:$0xff]  }
 0x283   :  { %4310 = vmatpush1.bf16.msra.mxu1 %v6003_v18  ;;  %4270 = vmatprep.subr.bf16.mxu0 %v6008_v54  ;;  %v6080_v18 = vld [vmem:[%s8345_s3 + $0x8cc] ss:$16 sps:$4 sm:$0xff]  }
 0x284   :  { %4311 = vmatprep.subr.bf16.mxu1 %v6011_v60  ;;  %v6083_v54 = vld [vmem:[%s8345_s3 + $0xacc] ss:$16 sps:$4 sm:$0xff]  }
 0x286   :  { %4271 = vmatpush1.bf16.msra.mxu0 %v6006_v39  ;;  %v6081_v39 = vld [vmem:[%s8345_s3 + $0xac8] ss:$16 sps:$4 sm:$0xff]  }
 0x287   :  { %4312 = vmatpush1.bf16.msra.mxu1 %v6009_v19  ;;  %4272 = vmatprep.subr.bf16.mxu0 %v6014_v57  ;;  %v6086_v19 = vld [vmem:[%s8345_s3 + $0x8ac] ss:$16 sps:$4 sm:$0xff]  }
 0x288   :  { %4313 = vmatprep.subr.bf16.mxu1 %v6017_v58 }
 0x28a   :  { %4273 = vmatpush1.bf16.msra.mxu0 %v6012_v61  ;;  %v6089_v61 = vld [vmem:[%s8345_s3 + $0xaac] ss:$16 sps:$4 sm:$0xff]  }
 0x28b   :  { %4314 = vmatpush1.bf16.msra.mxu1 %v6015_v24  ;;  %4274 = vmatprep.subr.bf16.mxu0 %v6020_v62 }
 0x28c   :  { %4315 = vmatprep.subr.bf16.mxu1 %v6023_v63 }
 0x28e   :  { %4275 = vmatpush1.bf16.msra.mxu0 %v6018_v1 }
 0x28f   :  { %4316 = vmatpush1.bf16.msra.mxu1 %v6021_v4  ;;  %4276 = vmatprep.subr.bf16.mxu0 %v6026_v6 }
 0x290   :  { %4317 = vmatprep.subr.bf16.mxu1 %v6029_v25  ;;  %v6090_v25 = vld [vmem:[%s8345_s3 + $0x888] ss:$16 sps:$4 sm:$0xff]  }
 0x292   :  { %4277 = vmatpush2.bf16.msra.mxu0 %v6024_v7  ;;  %v6095_v7 = vld [vmem:[%s8345_s3 + $0xa8c] ss:$16 sps:$4 sm:$0xff]  }
 0x293   :  { %4318 = vmatpush2.bf16.msra.mxu1 %v6027_v10  ;;  %4278 = vmatprep.subr.bf16.mxu0 %v6032_v11  ;;  %v6093_v10 = vld [vmem:[%s8345_s3 + $0xa88] ss:$16 sps:$4 sm:$0xff]   ;;  %v6098_v11 = vld [vmem:[%s8345_s3 + $0x86c] ss:$16 sps:$4 sm:$0xff]  }
 0x294   :  { %4319 = vmatprep.subr.bf16.mxu1 %v6035_v12  ;;  %v6101_v12 = vld [vmem:[%s8345_s3 + $0xa6c] ss:$16 sps:$4 sm:$0xff]  }
 0x296   :  { %4279 = vmatpush2.bf16.msra.mxu0 %v6030_v16  ;;  %v6096_v16 = vld [vmem:[%s8345_s3 + $0x868] ss:$16 sps:$4 sm:$0xff]  }
 0x297   :  { %4320 = vmatpush2.bf16.msra.mxu1 %v6033_v22  ;;  %4280 = vmatprep.subr.bf16.mxu0 %v6038_v8  ;;  %v6099_v22 = vld [vmem:[%s8345_s3 + $0xa68] ss:$16 sps:$4 sm:$0xff]   ;;  %v6104_v8 = vld [vmem:[%s8345_s3 + $0x84c] ss:$16 sps:$4 sm:$0xff]  }
 0x298   :  { %4321 = vmatprep.subr.bf16.mxu1 %v6041_v9  ;;  %v6107_v9 = vld [vmem:[%s8345_s3 + $0xa4c] ss:$16 sps:$4 sm:$0xff]  }
 0x29a   :  { %4281 = vmatpush2.bf16.msra.mxu0 %v6036_v45  ;;  %v6102_v45 = vld [vmem:[%s8345_s3 + $0x848] ss:$16 sps:$4 sm:$0xff]  }
 0x29b   :  { %4322 = vmatpush2.bf16.msra.mxu1 %v6039_v27  ;;  %4282 = vmatprep.subr.bf16.mxu0 %v6044_v46  ;;  %v6105_v27 = vld [vmem:[%s8345_s3 + $0xa48] ss:$16 sps:$4 sm:$0xff]   ;;  %v6110_v46 = vld [vmem:[%s8345_s3 + $0x82c] ss:$16 sps:$4 sm:$0xff]  }
 0x29c   :  { %4323 = vmatprep.subr.bf16.mxu1 %v6047_v28  ;;  %v6113_v28 = vld [vmem:[%s8345_s3 + $0xa2c] ss:$16 sps:$4 sm:$0xff]  }
 0x29e   :  { %4283 = vmatpush2.bf16.msra.mxu0 %v6042_v29  ;;  %v6108_v29 = vld [vmem:[%s8345_s3 + $0x828] ss:$16 sps:$4 sm:$0xff]  }
 0x29f   :  { %4324 = vmatpush2.bf16.msra.mxu1 %v6045_v32  ;;  %4284 = vmatprep.subr.bf16.mxu0 %v6050_v33  ;;  %v6111_v32 = vld [vmem:[%s8345_s3 + $0xa28] ss:$16 sps:$4 sm:$0xff]   ;;  %v6116_v33 = vld [vmem:[%s8345_s3 + $0x80c] ss:$16 sps:$4 sm:$0xff]  }
 0x2a0   :  { %4325 = vmatprep.subr.bf16.mxu1 %v6053_v34  ;;  %v6119_v34 = vld [vmem:[%s8345_s3 + $0xa0c] ss:$16 sps:$4 sm:$0xff]  }
 0x2a2   :  { %4285 = vmatpush2.bf16.msra.mxu0 %v6048_v35  ;;  %v6114_v35 = vld [vmem:[%s8345_s3 + $0x808] ss:$16 sps:$4 sm:$0xff]  }
 0x2a3   :  { %4326 = vmatpush2.bf16.msra.mxu1 %v6051_v14  ;;  %4286 = vmatprep.subr.bf16.mxu0 %v6056_v30  ;;  %v6117_v14 = vld [vmem:[%s8345_s3 + $0xa08] ss:$16 sps:$4 sm:$0xff]   ;;  %v6122_v30 = vld [vmem:[%s8345_s3 + $0x9ec] ss:$16 sps:$4 sm:$0xff]  }
 0x2a4   :  { %4327 = vmatprep.subr.bf16.mxu1 %v6059_v59  ;;  %v6125_v59 = vld [vmem:[%s8345_s3 + $0xbec] ss:$16 sps:$4 sm:$0xff]  }
 0x2a6   :  { %4287 = vmatpush2.bf16.msra.mxu0 %v6054_v31  ;;  %v6120_v31 = vld [vmem:[%s8345_s3 + $0x9e8] ss:$16 sps:$4 sm:$0xff]  }
 0x2a7   :  { %4328 = vmatpush2.bf16.msra.mxu1 %v6057_v55  ;;  %4288 = vmatprep.subr.bf16.mxu0 %v6062_v36  ;;  %v6123_v55 = vld [vmem:[%s8345_s3 + $0xbe8] ss:$16 sps:$4 sm:$0xff]   ;;  %v6128_v36 = vld [vmem:[%s8345_s3 + $0x9cc] ss:$16 sps:$4 sm:$0xff]  }
 0x2a8   :  { %4329 = vmatprep.subr.bf16.mxu1 %v6065_v37  ;;  %v6131_v37 = vld [vmem:[%s8345_s3 + $0xbcc] ss:$16 sps:$4 sm:$0xff]  }
 0x2aa   :  { %4289 = vmatpush2.bf16.msra.mxu0 %v6060_v20  ;;  %v6126_v20 = vld [vmem:[%s8345_s3 + $0x9c8] ss:$16 sps:$4 sm:$0xff]  }
 0x2ab   :  { %4330 = vmatpush2.bf16.msra.mxu1 %v6063_v43  ;;  %4290 = vmatprep.subr.bf16.mxu0 %v6068_v56  ;;  %v6129_v43 = vld [vmem:[%s8345_s3 + $0xbc8] ss:$16 sps:$4 sm:$0xff]   ;;  %v6134_v56 = vld [vmem:[%s8345_s3 + $0x9ac] ss:$16 sps:$4 sm:$0xff]  }
 0x2ac   :  { %4331 = vmatprep.subr.bf16.mxu1 %v6071_v0  ;;  %v6137_v0 = vld [vmem:[%s8345_s3 + $0xbac] ss:$16 sps:$4 sm:$0xff]  }
 0x2ae   :  { %4291 = vmatpush2.bf16.msra.mxu0 %v6066_v47  ;;  %v6132_v47 = vld [vmem:[%s8345_s3 + $0x9a8] ss:$16 sps:$4 sm:$0xff]  }
 0x2af   :  { %4332 = vmatpush2.bf16.msra.mxu1 %v6069_v21  ;;  %4342 = vmatprep.subr.bf16.mxu0 %v6074_v48  ;;  %v6135_v21 = vld [vmem:[%s8345_s3 + $0xba8] ss:$16 sps:$4 sm:$0xff]   ;;  %v6140_v48 = vld [vmem:[%s8345_s3 + $0x98c] ss:$16 sps:$4 sm:$0xff]  }
 0x2b0   :  { %4383 = vmatprep.subr.bf16.mxu1 %v6077_v53  ;;  %v6143_v53 = vld [vmem:[%s8345_s3 + $0xb8c] ss:$16 sps:$4 sm:$0xff]  }
 0x2b1   :  { %v4048_v60 = vpop.f32.mrf.mxu0  ;;  %4293 = vmatmul.mubr.bf16.vlgmr.msra.gmra.mxu0 %v6997_v49 }
 0x2b2   :  { %v4049_v57 = vadd.f32 %v4048_v60, %v7654_v15  ;;  %v4089_v58 = vpop.f32.mrf.mxu1  ;;  %4334 = vmatmul.mubr.bf16.vlgmr.msra.gmra.mxu1 %v7001_v50  ;;  %4343 = vmatpush1.bf16.msra.mxu0 %v6072_v2  ;;  %v6084_v50 = vld [vmem:[%s8345_s3 + $0x8a8] ss:$16 sps:$4 sm:$0xff]  }
 0x2b3   :  { %4374 = vmatprep.mubr.bf16.mxu0 %v7008_v52  ;;  %4384 = vmatpush1.bf16.msra.mxu1 %v6075_v38  ;;  %v4050_v49 = vpop.f32.mrf.mxu0  ;;  %v6087_v52 = vld [vmem:[%s8345_s3 + $0xaa8] ss:$16 sps:$4 sm:$0xff]  }
 0x2b4   :  { %v7859_v24 = vadd.f32 %v4089_v58, %v4049_v57  ;;  %4415 = vmatprep.mubr.bf16.mxu1 %v7018_v41  ;;  %v4051_v62 = vadd.f32 %v4050_v49, %v7661_v42  ;;  %v4091_v63 = vpop.f32.mrf.mxu1  ;;  %4344 = vmatprep.subr.bf16.mxu0 %v6080_v18  ;;  %v6092_v41 = vld [vmem:[%s8345_s3 + $0x88c] ss:$16 sps:$4 sm:$0xff]   ;;  %v6138_v2 = vld [vmem:[%s8345_s3 + $0x988] ss:$16 sps:$4 sm:$0xff]  }
 0x2b5   :  { %v4052_v15 = vpop.f32.mrf.mxu0  ;;  %4385 = vmatprep.subr.bf16.mxu1 %v6083_v54  ;;  %v6141_v38 = vld [vmem:[%s8345_s3 + $0xb88] ss:$16 sps:$4 sm:$0xff]   ;;  %v6149_v18 = vld [vmem:[%s8345_s3 + $0xb6c] ss:$16 sps:$4 sm:$0xff]  }
 0x2b6   :  { %v7869_v1 = vadd.f32 %v4091_v63, %v4051_v62  ;;  %v4093_v4 = vpop.f32.mrf.mxu1  ;;  %4345 = vmatpush1.bf16.msra.mxu0 %v6078_v40  ;;  %v6146_v40 = vld [vmem:[%s8345_s3 + $0x96c] ss:$16 sps:$4 sm:$0xff]   ;;  %v6144_v54 = vld [vmem:[%s8345_s3 + $0x968] ss:$16 sps:$4 sm:$0xff]  }
 0x2b7   :  { %4386 = vmatpush1.bf16.msra.mxu1 %v6081_v39  ;;  %v4053_v42 = vpop.f32.mrf.mxu0  ;;  %4346 = vmatprep.subr.bf16.mxu0 %v6086_v19  ;;  %v6147_v60 = vld [vmem:[%s8345_s3 + $0xb68] ss:$16 sps:$4 sm:$0xff]   ;;  %v6152_v39 = vld [vmem:[%s8345_s3 + $0x94c] ss:$16 sps:$4 sm:$0xff]  }
 0x2b8   :  { %v4094_v6 = vpop.f32.mrf.mxu1  ;;  %4387 = vmatprep.subr.bf16.mxu1 %v6089_v61  ;;  %v6155_v19 = vld [vmem:[%s8345_s3 + $0xb4c] ss:$16 sps:$4 sm:$0xff]   ;;  %v6150_v57 = vld [vmem:[%s8345_s3 + $0x948] ss:$16 sps:$4 sm:$0xff]  }
 0x2b9   :  { %v6153_v58 = vld [vmem:[%s8345_s3 + $0xb48] ss:$16 sps:$4 sm:$0xff]   ;;  %v6158_v61 = vld [vmem:[%s8345_s3 + $0x92c] ss:$16 sps:$4 sm:$0xff]  }
 0x2ba   :  { %4347 = vmatpush1.bf16.msra.mxu0 %v6084_v50  ;;  %v6161_v49 = vld [vmem:[%s8345_s3 + $0xb2c] ss:$16 sps:$4 sm:$0xff]   ;;  %v6156_v62 = vld [vmem:[%s8345_s3 + $0x928] ss:$16 sps:$4 sm:$0xff]  }
 0x2bb   :  { %4388 = vmatpush1.bf16.msra.mxu1 %v6087_v52  ;;  %4348 = vmatprep.subr.bf16.mxu0 %v6092_v41  ;;  %v6159_v63 = vld [vmem:[%s8345_s3 + $0xb28] ss:$16 sps:$4 sm:$0xff]   ;;  %v6164_v50 = vld [vmem:[%s8345_s3 + $0x90c] ss:$16 sps:$4 sm:$0xff]  }
 0x2bc   :  { %4389 = vmatprep.subr.bf16.mxu1 %v6095_v7  ;;  %v6167_v15 = vld [vmem:[%s8345_s3 + $0xb0c] ss:$16 sps:$4 sm:$0xff]   ;;  %v6162_v52 = vld [vmem:[%s8345_s3 + $0x908] ss:$16 sps:$4 sm:$0xff]  }
 0x2bd   :  { %v6165_v4 = vld [vmem:[%s8345_s3 + $0xb08] ss:$16 sps:$4 sm:$0xff]   ;;  %v6170_v41 = vld [vmem:[%s8345_s3 + $0xcec] ss:$16 sps:$4 sm:$0xff]  }
 0x2be   :  { %4349 = vmatpush1.bf16.msra.mxu0 %v6090_v25  ;;  %v6173_v42 = vld [vmem:[%s8345_s3 + $0xeec] ss:$16 sps:$4 sm:$0xff]   ;;  %v6168_v6 = vld [vmem:[%s8345_s3 + $0xce8] ss:$16 sps:$4 sm:$0xff]  }
 0x2bf   :  { %4390 = vmatpush1.bf16.msra.mxu1 %v6093_v10  ;;  %4350 = vmatprep.subr.bf16.mxu0 %v6098_v11  ;;  %v6171_v25 = vld [vmem:[%s8345_s3 + $0xee8] ss:$16 sps:$4 sm:$0xff]   ;;  %v6176_v7 = vld [vmem:[%s8345_s3 + $0xccc] ss:$16 sps:$4 sm:$0xff]  }
 0x2c0   :  { %4391 = vmatprep.subr.bf16.mxu1 %v6101_v12  ;;  %v6179_v11 = vld [vmem:[%s8345_s3 + $0xecc] ss:$16 sps:$4 sm:$0xff]  }
 0x2c2   :  { %4351 = vmatpush1.bf16.msra.mxu0 %v6096_v16 }
 0x2c3   :  { %4392 = vmatpush1.bf16.msra.mxu1 %v6099_v22  ;;  %4352 = vmatprep.subr.bf16.mxu0 %v6104_v8  ;;  %v6174_v22 = vld [vmem:[%s8345_s3 + $0xcc8] ss:$16 sps:$4 sm:$0xff]  }
 0x2c4   :  { %4393 = vmatprep.subr.bf16.mxu1 %v6107_v9 }
 0x2c6   :  { %4353 = vmatpush1.bf16.msra.mxu0 %v6102_v45 }
 0x2c7   :  { %4394 = vmatpush1.bf16.msra.mxu1 %v6105_v27  ;;  %4354 = vmatprep.subr.bf16.mxu0 %v6110_v46  ;;  %v6180_v46 = vld [vmem:[%s8345_s3 + $0xca8] ss:$16 sps:$4 sm:$0xff]  }
 0x2c8   :  { %4395 = vmatprep.subr.bf16.mxu1 %v6113_v28 }
 0x2ca   :  { %4355 = vmatpush1.bf16.msra.mxu0 %v6108_v29  ;;  %v6188_v29 = vld [vmem:[%s8345_s3 + $0xc8c] ss:$16 sps:$4 sm:$0xff]  }
 0x2cb   :  { %4396 = vmatpush1.bf16.msra.mxu1 %v6111_v32  ;;  %4356 = vmatprep.subr.bf16.mxu0 %v6116_v33  ;;  %v6191_v33 = vld [vmem:[%s8345_s3 + $0xe8c] ss:$16 sps:$4 sm:$0xff]  }
 0x2cc   :  { %4397 = vmatprep.subr.bf16.mxu1 %v6119_v34  ;;  %v6186_v34 = vld [vmem:[%s8345_s3 + $0xc88] ss:$16 sps:$4 sm:$0xff]  }
 0x2ce   :  { %4357 = vmatpush1.bf16.msra.mxu0 %v6114_v35  ;;  %v6189_v35 = vld [vmem:[%s8345_s3 + $0xe88] ss:$16 sps:$4 sm:$0xff]  }
 0x2cf   :  { %4398 = vmatpush1.bf16.msra.mxu1 %v6117_v14  ;;  %4358 = vmatprep.subr.bf16.mxu0 %v6122_v30  ;;  %v6194_v14 = vld [vmem:[%s8345_s3 + $0xc6c] ss:$16 sps:$4 sm:$0xff]  }
 0x2d0   :  { %4399 = vmatprep.subr.bf16.mxu1 %v6125_v59  ;;  %v6197_v30 = vld [vmem:[%s8345_s3 + $0xe6c] ss:$16 sps:$4 sm:$0xff]   ;;  %v6192_v59 = vld [vmem:[%s8345_s3 + $0xc68] ss:$16 sps:$4 sm:$0xff]  }
 0x2d2   :  { %4359 = vmatpush2.bf16.msra.mxu0 %v6120_v31  ;;  %v6195_v31 = vld [vmem:[%s8345_s3 + $0xe68] ss:$16 sps:$4 sm:$0xff]  }
 0x2d3   :  { %4400 = vmatpush2.bf16.msra.mxu1 %v6123_v55  ;;  %4360 = vmatprep.subr.bf16.mxu0 %v6128_v36  ;;  %v6200_v55 = vld [vmem:[%s8345_s3 + $0xc4c] ss:$16 sps:$4 sm:$0xff]  }
 0x2d4   :  { %4401 = vmatprep.subr.bf16.mxu1 %v6131_v37  ;;  %v6203_v36 = vld [vmem:[%s8345_s3 + $0xe4c] ss:$16 sps:$4 sm:$0xff]   ;;  %v6198_v37 = vld [vmem:[%s8345_s3 + $0xc48] ss:$16 sps:$4 sm:$0xff]  }
 0x2d6   :  { %4361 = vmatpush2.bf16.msra.mxu0 %v6126_v20  ;;  %v6201_v20 = vld [vmem:[%s8345_s3 + $0xe48] ss:$16 sps:$4 sm:$0xff]  }
 0x2d7   :  { %4402 = vmatpush2.bf16.msra.mxu1 %v6129_v43  ;;  %4362 = vmatprep.subr.bf16.mxu0 %v6134_v56  ;;  %v6206_v43 = vld [vmem:[%s8345_s3 + $0xc2c] ss:$16 sps:$4 sm:$0xff]  }
 0x2d8   :  { %4403 = vmatprep.subr.bf16.mxu1 %v6137_v0  ;;  %v6209_v56 = vld [vmem:[%s8345_s3 + $0xe2c] ss:$16 sps:$4 sm:$0xff]   ;;  %v6204_v0 = vld [vmem:[%s8345_s3 + $0xc28] ss:$16 sps:$4 sm:$0xff]  }
 0x2da   :  { %4363 = vmatpush2.bf16.msra.mxu0 %v6132_v47  ;;  %v6207_v47 = vld [vmem:[%s8345_s3 + $0xe28] ss:$16 sps:$4 sm:$0xff]  }
 0x2db   :  { %4404 = vmatpush2.bf16.msra.mxu1 %v6135_v21  ;;  %4364 = vmatprep.subr.bf16.mxu0 %v6140_v48  ;;  %v6212_v21 = vld [vmem:[%s8345_s3 + $0xc0c] ss:$16 sps:$4 sm:$0xff]  }
 0x2dc   :  { %4405 = vmatprep.subr.bf16.mxu1 %v6143_v53  ;;  %v6215_v48 = vld [vmem:[%s8345_s3 + $0xe0c] ss:$16 sps:$4 sm:$0xff]   ;;  %v6210_v53 = vld [vmem:[%s8345_s3 + $0xc08] ss:$16 sps:$4 sm:$0xff]  }
 0x2de   :  { %4365 = vmatpush2.bf16.msra.mxu0 %v6138_v2  ;;  %v6213_v2 = vld [vmem:[%s8345_s3 + $0xe08] ss:$16 sps:$4 sm:$0xff]  }
 0x2df   :  { %4406 = vmatpush2.bf16.msra.mxu1 %v6141_v38  ;;  %4366 = vmatprep.subr.bf16.mxu0 %v6146_v40  ;;  %v6218_v38 = vld [vmem:[%s8345_s3 + $0xdec] ss:$16 sps:$4 sm:$0xff]  }
 0x2e0   :  { %4407 = vmatprep.subr.bf16.mxu1 %v6149_v18  ;;  %v6221_v40 = vld [vmem:[%s8345_s3 + $0xfec] ss:$16 sps:$4 sm:$0xff]   ;;  %v6216_v18 = vld [vmem:[%s8345_s3 + $0xde8] ss:$16 sps:$4 sm:$0xff]  }
 0x2e2   :  { %4367 = vmatpush2.bf16.msra.mxu0 %v6144_v54  ;;  %v6219_v54 = vld [vmem:[%s8345_s3 + $0xfe8] ss:$16 sps:$4 sm:$0xff]  }
 0x2e3   :  { %4408 = vmatpush2.bf16.msra.mxu1 %v6147_v60  ;;  %4368 = vmatprep.subr.bf16.mxu0 %v6152_v39  ;;  %v6224_v60 = vld [vmem:[%s8345_s3 + $0xdcc] ss:$16 sps:$4 sm:$0xff]  }
 0x2e4   :  { %4409 = vmatprep.subr.bf16.mxu1 %v6155_v19  ;;  %v6227_v39 = vld [vmem:[%s8345_s3 + $0xfcc] ss:$16 sps:$4 sm:$0xff]   ;;  %v6222_v19 = vld [vmem:[%s8345_s3 + $0xdc8] ss:$16 sps:$4 sm:$0xff]  }
 0x2e6   :  { %4369 = vmatpush2.bf16.msra.mxu0 %v6150_v57  ;;  %v6225_v57 = vld [vmem:[%s8345_s3 + $0xfc8] ss:$16 sps:$4 sm:$0xff]  }
 0x2e7   :  { %4410 = vmatpush2.bf16.msra.mxu1 %v6153_v58  ;;  %4370 = vmatprep.subr.bf16.mxu0 %v6158_v61  ;;  %v6230_v58 = vld [vmem:[%s8345_s3 + $0xdac] ss:$16 sps:$4 sm:$0xff]  }
 0x2e8   :  { %4411 = vmatprep.subr.bf16.mxu1 %v6161_v49  ;;  %v6233_v61 = vld [vmem:[%s8345_s3 + $0xfac] ss:$16 sps:$4 sm:$0xff]   ;;  %v6228_v49 = vld [vmem:[%s8345_s3 + $0xda8] ss:$16 sps:$4 sm:$0xff]  }
 0x2ea   :  { %4371 = vmatpush2.bf16.msra.mxu0 %v6156_v62  ;;  %v6231_v62 = vld [vmem:[%s8345_s3 + $0xfa8] ss:$16 sps:$4 sm:$0xff]  }
 0x2eb   :  { %4412 = vmatpush2.bf16.msra.mxu1 %v6159_v63  ;;  %4372 = vmatprep.subr.bf16.mxu0 %v6164_v50  ;;  %v6236_v63 = vld [vmem:[%s8345_s3 + $0xd8c] ss:$16 sps:$4 sm:$0xff]  }
 0x2ec   :  { %4413 = vmatprep.subr.bf16.mxu1 %v6167_v15  ;;  %v6239_v50 = vld [vmem:[%s8345_s3 + $0xf8c] ss:$16 sps:$4 sm:$0xff]   ;;  %v6234_v15 = vld [vmem:[%s8345_s3 + $0xd88] ss:$16 sps:$4 sm:$0xff]  }
 0x2ee   :  { %4373 = vmatpush2.bf16.msra.mxu0 %v6162_v52  ;;  %v6237_v52 = vld [vmem:[%s8345_s3 + $0xf88] ss:$16 sps:$4 sm:$0xff]  }
 0x2ef   :  { %4414 = vmatpush2.bf16.msra.mxu1 %v6165_v4  ;;  %4424 = vmatprep.subr.bf16.mxu0 %v6170_v41  ;;  %v6242_v4 = vld [vmem:[%s8345_s3 + $0xd6c] ss:$16 sps:$4 sm:$0xff]  }
 0x2f0   :  { %4465 = vmatprep.subr.bf16.mxu1 %v6173_v42  ;;  %v6245_v41 = vld [vmem:[%s8345_s3 + $0xf6c] ss:$16 sps:$4 sm:$0xff]   ;;  %v6240_v42 = vld [vmem:[%s8345_s3 + $0xd68] ss:$16 sps:$4 sm:$0xff]  }
 0x2f1   :  { %v4130_v10 = vpop.f32.mrf.mxu0  ;;  %4375 = vmatmul.mubr.bf16.vlgmr.msra.gmra.mxu0 %v7209_v13  ;;  %v6177_v13 = vld [vmem:[%s8345_s3 + $0xec8] ss:$16 sps:$4 sm:$0xff]  }
 0x2f2   :  { %v4131_v12 = vadd.f32 %v4130_v10, %v7859_v24  ;;  %v4171_v16 = vpop.f32.mrf.mxu1  ;;  %4416 = vmatmul.mubr.bf16.vlgmr.msra.gmra.mxu1 %v7216_v17  ;;  %4425 = vmatpush1.bf16.msra.mxu0 %v6168_v6  ;;  %v6182_v24 = vld [vmem:[%s8345_s3 + $0xcac] ss:$16 sps:$4 sm:$0xff]   ;;  %v6243_v6 = vld [vmem:[%s8345_s3 + $0xf68] ss:$16 sps:$4 sm:$0xff]  }
 0x2f3   :  { %4456 = vmatprep.mubr.bf16.mxu0 %v7223_v23  ;;  %4466 = vmatpush1.bf16.msra.mxu1 %v6171_v25  ;;  %v8052_v8 = vpop.f32.mrf.mxu0  ;;  %v6185_v23 = vld [vmem:[%s8345_s3 + $0xeac] ss:$16 sps:$4 sm:$0xff]   ;;  %v6246_v10 = vld [vmem:[%s8345_s3 + $0xd48] ss:$16 sps:$4 sm:$0xff]  }
 0x2f4   :  { %v8060_v9 = vadd.f32 %v4171_v16, %v4131_v12  ;;  %4497 = vmatprep.mubr.bf16.mxu1 %v7231_v26  ;;  %v8063_v17 = vpop.f32.mrf.mxu1  ;;  %4426 = vmatprep.subr.bf16.mxu0 %v6176_v7  ;;  %v6183_v26 = vld [vmem:[%s8345_s3 + $0xea8] ss:$16 sps:$4 sm:$0xff]   ;;  %v6248_v25 = vld [vmem:[%s8345_s3 + $0xd4c] ss:$16 sps:$4 sm:$0xff]  }
 0x2f5   :  { %v4134_v45 = vpop.f32.mrf.mxu0  ;;  %4467 = vmatprep.subr.bf16.mxu1 %v6179_v11  ;;  %v6251_v7 = vld [vmem:[%s8345_s3 + $0xf4c] ss:$16 sps:$4 sm:$0xff]   ;;  %v6249_v11 = vld [vmem:[%s8345_s3 + $0xf48] ss:$16 sps:$4 sm:$0xff]  }
 0x2f6   :  { %v4175_v27 = vpop.f32.mrf.mxu1  ;;  %4427 = vmatpush1.bf16.msra.mxu0 %v6174_v22  ;;  %v6254_v12 = vld [vmem:[%s8345_s3 + $0xd2c] ss:$16 sps:$4 sm:$0xff]   ;;  %v4133_v22 = vadd.f32 %v8052_v8, %v7869_v1  ;;  %v6258_v45 = vld [vmem:[%s8345_s3 + $0xd08] ss:$16 sps:$4 sm:$0xff]  }
 0x2f7   :  { %4468 = vmatpush1.bf16.msra.mxu1 %v6177_v13  ;;  %v4135_v28 = vpop.f32.mrf.mxu0  ;;  %4428 = vmatprep.subr.bf16.mxu0 %v6182_v24  ;;  %v6257_v16 = vld [vmem:[%s8345_s3 + $0xf2c] ss:$16 sps:$4 sm:$0xff]   ;;  %v6252_v13 = vld [vmem:[%s8345_s3 + $0xd28] ss:$16 sps:$4 sm:$0xff]  }
 0x2f8   :  { %v4176_v32 = vpop.f32.mrf.mxu1  ;;  %4469 = vmatprep.subr.bf16.mxu1 %v6185_v23  ;;  %v6255_v24 = vld [vmem:[%s8345_s3 + $0xf28] ss:$16 sps:$4 sm:$0xff]   ;;  %v6260_v23 = vld [vmem:[%s8345_s3 + $0xd0c] ss:$16 sps:$4 sm:$0xff]   ;;  %v4174_v8 = vadd.f32 %v8063_v17, %v4133_v22  ;;  %v6296_v17 = vld [vmem:[%s8348_s4] sm:$0xf] }
 0x2f9   :  { %v6263_v1 = vld [vmem:[%s8345_s3 + $0xf0c] ss:$16 sps:$4 sm:$0xff]   ;;  %v6261_v27 = vld [vmem:[%s8345_s3 + $0xf08] ss:$16 sps:$4 sm:$0xff]   ;;  %v6266_v32 = vld [vmem:[%s8349_s5 + $0x70] sm:$0xff]  }
 0x2fa   :  { %4429 = vmatpush1.bf16.msra.mxu0 %v6180_v46  ;;  %v6264_v46 = vld [vmem:[%s8349_s5 + $0x78] sm:$0xff]   ;;  %v4507_v28 = vmax.f32 %v4174_v8, 0.0  ;;  %v6294_v8 = vld [vmem:[%s8349_s5 + $0xc0] sm:$0xff]  }
 0x2fb   :  { %4470 = vmatpush1.bf16.msra.mxu1 %v6183_v26  ;;  %4430 = vmatprep.subr.bf16.mxu0 %v6188_v29  ;;  %v1281_v26 = vrot.slane %v6296_v17, %v6652_v3  ;;  %v6265_v29 = vld [vmem:[%s8349_s5 + $0x38] sm:$0xff]   ;;  %v6267_v3 = vld [vmem:[%s8349_s5 + $0x30] sm:$0xff]  }
 0x2fc   :  { %4471 = vmatprep.subr.bf16.mxu1 %v6191_v33  ;;  %v1285_v33 = vrot.slane %v6296_v17, %v6661_v5  ;;  %v6268_v5 = vld [vmem:[%s8349_s5 + $0x68] sm:$0xff]  }
 0x2fe   :  { %4431 = vmatpush1.bf16.msra.mxu0 %v6186_v34  ;;  %v4511_v34 = vpack.c.bf16 %v4507_v28, %v4507_v28 }
 0x2ff   :  { %4472 = vmatpush1.bf16.msra.mxu1 %v6189_v35  ;;  %4432 = vmatprep.subr.bf16.mxu0 %v6194_v14 }
 0x300   :  { %4473 = vmatprep.subr.bf16.mxu1 %v6197_v30 }
 0x302   :  { %4433 = vmatpush1.bf16.msra.mxu0 %v6192_v59 }
 0x303   :  { %4474 = vmatpush1.bf16.msra.mxu1 %v6195_v31  ;;  %4434 = vmatprep.subr.bf16.mxu0 %v6200_v55 }
 0x304   :  { %4475 = vmatprep.subr.bf16.mxu1 %v6203_v36 }
 0x306   :  { %4435 = vmatpush1.bf16.msra.mxu0 %v6198_v37 }
 0x307   :  { %4476 = vmatpush1.bf16.msra.mxu1 %v6201_v20  ;;  %4436 = vmatprep.subr.bf16.mxu0 %v6206_v43 }
 0x308   :  { %4477 = vmatprep.subr.bf16.mxu1 %v6209_v56  ;;  %v6270_v56 = vld [vmem:[%s8349_s5 + $0x60] sm:$0xff]  }
 0x30a   :  { %4437 = vmatpush1.bf16.msra.mxu0 %v6204_v0 }
 0x30b   :  { %4478 = vmatpush1.bf16.msra.mxu1 %v6207_v47  ;;  %4438 = vmatprep.subr.bf16.mxu0 %v6212_v21  ;;  %v6280_v47 = vld [vmem:[%s8349_s5 + $0xf8] sm:$0xff]  }
 0x30c   :  { %4479 = vmatprep.subr.bf16.mxu1 %v6215_v48  ;;  %v6281_v21 = vld [vmem:[%s8349_s5 + $0xb8] sm:$0xff]   ;;  %v6282_v48 = vld [vmem:[%s8349_s5 + $0xf0] sm:$0xff]  }
 0x30e   :  { %4439 = vmatpush1.bf16.msra.mxu0 %v6210_v53  ;;  %v6271_v53 = vld [vmem:[%s8349_s5 + $0x20] sm:$0xff]  }
 0x30f   :  { %4480 = vmatpush1.bf16.msra.mxu1 %v6213_v2  ;;  %4440 = vmatprep.subr.bf16.mxu0 %v6218_v38  ;;  %v6272_v2 = vld [vmem:[%s8349_s5 + $0x58] sm:$0xff]   ;;  %v6283_v38 = vld [vmem:[%s8349_s5 + $0xb0] sm:$0xff]  }
 0x310   :  { %4481 = vmatprep.subr.bf16.mxu1 %v6221_v40  ;;  %v6284_v40 = vld [vmem:[%s8349_s5 + $0xe8] sm:$0xff]  }
 0x312   :  { %4441 = vmatpush2.bf16.msra.mxu0 %v6216_v18  ;;  %v6273_v18 = vld [vmem:[%s8349_s5 + $0x18] sm:$0xff]  }
 0x313   :  { %4482 = vmatpush2.bf16.msra.mxu1 %v6219_v54  ;;  %4442 = vmatprep.subr.bf16.mxu0 %v6224_v60  ;;  %v6274_v54 = vld [vmem:[%s8349_s5 + $0x50] sm:$0xff]   ;;  %v6285_v60 = vld [vmem:[%s8349_s5 + $0xa8] sm:$0xff]  }
 0x314   :  { %4483 = vmatprep.subr.bf16.mxu1 %v6227_v39  ;;  %v6286_v39 = vld [vmem:[%s8349_s5 + $0xe0] sm:$0xff]  }
 0x316   :  { %4443 = vmatpush2.bf16.msra.mxu0 %v6222_v19  ;;  %v6275_v19 = vld [vmem:[%s8349_s5 + $0x10] sm:$0xff]  }
 0x317   :  { %4484 = vmatpush2.bf16.msra.mxu1 %v6225_v57  ;;  %4444 = vmatprep.subr.bf16.mxu0 %v6230_v58  ;;  %v6276_v57 = vld [vmem:[%s8349_s5 + $0x48] sm:$0xff]   ;;  %v6287_v58 = vld [vmem:[%s8349_s5 + $0xa0] sm:$0xff]  }
 0x318   :  { %4485 = vmatprep.subr.bf16.mxu1 %v6233_v61  ;;  %v6288_v61 = vld [vmem:[%s8349_s5 + $0xd8] sm:$0xff]  }
 0x31a   :  { %4445 = vmatpush2.bf16.msra.mxu0 %v6228_v49  ;;  %v6277_v49 = vld [vmem:[%s8349_s5 + $0x8] sm:$0xff]  }
 0x31b   :  { %4486 = vmatpush2.bf16.msra.mxu1 %v6231_v62  ;;  %4446 = vmatprep.subr.bf16.mxu0 %v6236_v63  ;;  %v6278_v62 = vld [vmem:[%s8349_s5 + $0x40] sm:$0xff]   ;;  %v6289_v63 = vld [vmem:[%s8349_s5 + $0x98] sm:$0xff]  }
 0x31c   :  { %4487 = vmatprep.subr.bf16.mxu1 %v6239_v50  ;;  %v6279_v50 = vld [vmem:[%s8349_s5] sm:$0xff]  }
 0x31e   :  { %4447 = vmatpush2.bf16.msra.mxu0 %v6234_v15  ;;  %v4506_v15 = vmax.f32 %v8060_v9, 0.0 }
 0x31f   :  { %4488 = vmatpush2.bf16.msra.mxu1 %v6237_v52  ;;  %4448 = vmatprep.subr.bf16.mxu0 %v6242_v4 }
 0x320   :  { %4489 = vmatprep.subr.bf16.mxu1 %v6245_v41  ;;  %v4510_v52 = vpack.c.bf16 %v4506_v15, %v4506_v15  ;;  %v6290_v41 = vld [vmem:[%s8349_s5 + $0xd0] sm:$0xff]  }
 0x322   :  { %4449 = vmatpush2.bf16.msra.mxu0 %v6240_v42 }
 0x323   :  { %4490 = vmatpush2.bf16.msra.mxu1 %v6243_v6  ;;  %4450 = vmatprep.subr.bf16.mxu0 %v6248_v25  ;;  %v6291_v25 = vld [vmem:[%s8349_s5 + $0x90] sm:$0xff]  }
 0x324   :  { %4491 = vmatprep.subr.bf16.mxu1 %v6251_v7 }
 0x326   :  { %4451 = vmatpush2.bf16.msra.mxu0 %v6246_v10 }
 0x327   :  { %4492 = vmatpush2.bf16.msra.mxu1 %v6249_v11  ;;  %4452 = vmatprep.subr.bf16.mxu0 %v6254_v12 }
 0x328   :  { %4493 = vmatprep.subr.bf16.mxu1 %v6257_v16  ;;  %v6292_v16 = vld [vmem:[%s8349_s5 + $0xc8] sm:$0xff]  }
 0x32a   :  { %4453 = vmatpush2.bf16.msra.mxu0 %v6252_v13 }
 0x32b   :  { %4494 = vmatpush2.bf16.msra.mxu1 %v6255_v24  ;;  %4454 = vmatprep.subr.bf16.mxu0 %v6260_v23  ;;  %v6293_v24 = vld [vmem:[%s8349_s5 + $0x88] sm:$0xff]  }
 0x32c   :  { %4495 = vmatprep.subr.bf16.mxu1 %v6263_v1 }
 0x32e   :  { %4455 = vmatpush2.bf16.msra.mxu0 %v6258_v45  ;;  %v6295_v45 = vld [vmem:[%s8349_s5 + $0x80] sm:$0xff]  }
 0x32f   :  { %4496 = vmatpush2.bf16.msra.mxu1 %v6261_v27  ;;  %5446 = vmatprep.subr.bf16.mxu0 %v6264_v46 }
 0x330   :  { %5468 = vmatprep.subr.bf16.mxu1 %v6280_v47 }
 0x331   :  { %v4212_v35 = vpop.f32.mrf.mxu0  ;;  %4457 = vmatmul.mubr.bf16.vlgmr.msra.gmra.mxu0 %v7425_v44 }
 0x332   :  { %v4213_v14 = vadd.f32 %v4212_v35, %v1281_v26  ;;  %v4253_v30 = vpop.f32.mrf.mxu1  ;;  %4498 = vmatmul.mubr.bf16.vlgmr.msra.gmra.mxu1 %v7432_v51  ;;  %5447 = vmatpush3.bf16.msra.mxu0 %v6265_v29  ;;  %v6269_v51 = vld [vmem:[%s8349_s5 + $0x28] sm:$0xff]  }
 0x333   :  { %4809 = vmatprep.mubr.bf16.mxu0 %v4511_v34  ;;  %v4214_v59 = vpop.f32.mrf.mxu0  ;;  %5448 = vmatprep.subr.bf16.mxu0 %v6266_v32 }
 0x334   :  { %v4254_v31 = vadd.f32 %v4253_v30, %v4213_v14  ;;  %v4215_v55 = vadd.f32 %v4214_v59, %v1285_v33  ;;  %v4255_v36 = vpop.f32.mrf.mxu1  ;;  %5469 = vmatpush3.bf16.msra.mxu1 %v6281_v21 }
 0x335   :  { %v4216_v44 = vpop.f32.mrf.mxu0  ;;  %5470 = vmatprep.subr.bf16.mxu1 %v6282_v48 }
 0x336   :  { %v4256_v37 = vadd.f32 %v4255_v36, %v4215_v55  ;;  %v4257_v20 = vpop.f32.mrf.mxu1  ;;  %5449 = vmatpush3.bf16.msra.mxu0 %v6267_v3 }
 0x337   :  { %v4217_v43 = vpop.f32.mrf.mxu0  ;;  %5450 = vmatprep.subr.bf16.mxu0 %v6268_v5 }
 0x338   :  { %v4258_v0 = vpop.f32.mrf.mxu1  ;;  %5471 = vmatpush3.bf16.msra.mxu1 %v6283_v38 }
 0x339   :  { %5472 = vmatprep.subr.bf16.mxu1 %v6284_v40 }
 0x33a   :  { %5451 = vmatpush3.bf16.msra.mxu0 %v6269_v51 }
 0x33b   :  { %5452 = vmatprep.subr.bf16.mxu0 %v6270_v56 }
 0x33c   :  { %5473 = vmatpush3.bf16.msra.mxu1 %v6285_v60 }
 0x33d   :  { %5474 = vmatprep.subr.bf16.mxu1 %v6286_v39 }
 0x33e   :  { %5453 = vmatpush3.bf16.msra.mxu0 %v6271_v53 }
 0x33f   :  { %5454 = vmatprep.subr.bf16.mxu0 %v6272_v2 }
 0x340   :  { %5475 = vmatpush3.bf16.msra.mxu1 %v6287_v58 }
 0x341   :  { %5476 = vmatprep.subr.bf16.mxu1 %v6288_v61 }
 0x342   :  { %5455 = vmatpush3.bf16.msra.mxu0 %v6273_v18 }
 0x343   :  { %5456 = vmatprep.subr.bf16.mxu0 %v6274_v54  ;;  %v5394_v54 = vld [vmem:[%s8350_s6] ss:$0 sm:$0xff] }
 0x344   :  { %5477 = vmatpush3.bf16.msra.mxu1 %v6289_v63 }
 0x345   :  { %5478 = vmatprep.subr.bf16.mxu1 %v6290_v41 }
 0x346   :  { %5457 = vmatpush3.bf16.msra.mxu0 %v6275_v19 }
 0x347   :  { %5458 = vmatprep.subr.bf16.mxu0 %v6276_v57 }
 0x348   :  { %5479 = vmatpush3.bf16.msra.mxu1 %v6291_v25 }
 0x349   :  { %5480 = vmatprep.subr.bf16.mxu1 %v6292_v16 }
 0x34a   :  { %5459 = vmatpush3.bf16.msra.mxu0 %v6277_v49 }
 0x34b   :  { %5460 = vmatprep.subr.bf16.mxu0 %v6278_v62 }
 0x34c   :  { %5481 = vmatpush3.bf16.msra.mxu1 %v6293_v24 }
 0x34d   :  { %5482 = vmatprep.subr.bf16.mxu1 %v6294_v8 }
 0x34e   :  { %5461 = vmatpush3.bf16.msra.mxu0 %v6279_v50 }
 0x350   :  { %5483 = vmatpush3.bf16.msra.mxu1 %v6295_v45 }
 0x351   :  { %4810 = vmatmul.mubr.bf16.vlgmr.msra.gmra.mxu0 %v4510_v52 }
 0x371   :  { %v4294_v4 = vpop.f32.mrf.mxu0 }
 0x372   :  { %v4295_v42 = vadd.f32 %v4294_v4, %v4254_v31  ;;  %v4335_v6 = vpop.f32.mrf.mxu1 }
 0x373   :  { %v4296_v7 = vpop.f32.mrf.mxu0 }
 0x374   :  { %v4336_v10 = vadd.f32 %v4335_v6, %v4295_v42  ;;  %v4297_v9 = vadd.f32 %v4296_v7, %v4256_v37  ;;  %v4337_v11 = vpop.f32.mrf.mxu1 }
 0x375   :  { %v4298_v12 = vpop.f32.mrf.mxu0 }
 0x376   :  { %v4338_v22 = vadd.f32 %v4337_v11, %v4297_v9  ;;  %v4339_v13 = vpop.f32.mrf.mxu1 }
 0x377   :  { %v4299_v23 = vpop.f32.mrf.mxu0 }
 0x378   :  { %v4340_v1 = vpop.f32.mrf.mxu1 }
 0x3b1   :  { %v4376_v27 = vpop.f32.mrf.mxu0 }
 0x3b2   :  { %v4377_v46 = vadd.f32 %v4376_v27, %v4336_v10  ;;  %v4417_v28 = vpop.f32.mrf.mxu1 }
 0x3b3   :  { %v4378_v17 = vpop.f32.mrf.mxu0 }
 0x3b4   :  { %v4418_v26 = vadd.f32 %v4417_v28, %v4377_v46  ;;  %v4419_v29 = vpop.f32.mrf.mxu1  ;;  %v4379_v14 = vadd.f32 %v4378_v17, %v4338_v22 }
 0x3b5   :  { %v4380_v32 = vpop.f32.mrf.mxu0 }
 0x3b6   :  { %v4421_v33 = vpop.f32.mrf.mxu1  ;;  %v4420_v3 = vadd.f32 %v4419_v29, %v4379_v14 }
 0x3b7   :  { %v4381_v34 = vpop.f32.mrf.mxu0 }
 0x3b8   :  { %v4422_v35 = vpop.f32.mrf.mxu1 }
 0x3f1   :  { %v4458_v30 = vpop.f32.mrf.mxu0 }
 0x3f2   :  { %v4459_v59 = vadd.f32 %v4458_v30, %v4418_v26  ;;  %v4499_v5 = vpop.f32.mrf.mxu1 }
 0x3f3   :  { %v4460_v31 = vpop.f32.mrf.mxu0 }
 0x3f4   :  { %v4500_v55 = vadd.f32 %v4499_v5, %v4459_v59  ;;  %v4461_v36 = vadd.f32 %v4460_v31, %v4420_v3  ;;  %v4501_v44 = vpop.f32.mrf.mxu1 }
 0x3f5   :  { %v4462_v37 = vpop.f32.mrf.mxu0 }
 0x3f6   :  { %v4502_v20 = vadd.f32 %v4501_v44, %v4461_v36  ;;  %v4503_v51 = vpop.f32.mrf.mxu1  ;;  %v4508_v43 = vmax.f32 %v4500_v55, 0.0 }
 0x3f7   :  { %v4463_v56 = vpop.f32.mrf.mxu0 }
 0x3f8   :  { %v4509_v0 = vmax.f32 %v4502_v20, 0.0  ;;  %v4504_v47 = vpop.f32.mrf.mxu1  ;;  %v4512_v48 = vpack.c.bf16 %v4508_v43, %v4508_v43 }
 0x3fa   :  { %v4513_v21 = vpack.c.bf16 %v4509_v0, %v4509_v0 }
 0x3fc   :  { %4849 = vmatprep.mubr.bf16.mxu1 %v4513_v21 }
 0x3fd   :  { %4850 = vmatmul.mubr.bf16.vlgmr.msra.gmra.mxu1 %v4512_v48 }
 0x411   :  { %v5462_v53 = vpop.f32.mrf.mxu0 }
 0x413   :  { %v5463_v2 = vpop.f32.mrf.mxu0 }
 0x414   :  { %v5464_v38 = vadd.f32 %v5463_v2, %v5462_v53 }
 0x415   :  { %v5465_v40 = vpop.f32.mrf.mxu0 }
 0x416   :  { %v4812_v19 = vadd.f32 %v5464_v38, %v5394_v54 }
 0x417   :  { %v5466_v18 = vpop.f32.mrf.mxu0 }
 0x4bd   :  { %v5484_v60 = vpop.f32.mrf.mxu1 }
 0x4bf   :  { %v5485_v39 = vpop.f32.mrf.mxu1 }
 0x4c0   :  { %v5486_v57 = vadd.f32 %v5485_v39, %v5484_v60 }
 0x4c1   :  { %v5487_v58 = vpop.f32.mrf.mxu1 }
 0x4c2   :  { %v4852_v61 = vadd.f32 %v5486_v57, %v4812_v19 }
 0x4c3   :  { %v5488_v49 = vpop.f32.mrf.mxu1 }
 0x4c4   :  { %4857 = vst [vmem:[%s8351_s8] sm:$0xff] %v4852_v61 }

</bundles_post_ra>
